<compile_context>
chip_gen: v7x
topology: tpu7x:2x2x1
jax: 0.10.0
libtpu: 0.0.40
codegen_flags: <defaults>
</compile_context>

<pallas_src>
from functools import partial

import jax
import jax.numpy as jnp
from jax.experimental import pallas as pl
from jax.experimental.pallas import tpu as pltpu

EPS = 1e-5
MATMUL_DTYPE = jnp.bfloat16  # MXU-native dtype for layers 2-4


def _mlp_kernel(x_ref,
                w1_ref, b1_ref, g1_ref, be1_ref,
                w2_ref, b2_ref, g2_ref, be2_ref,
                w3_ref, b3_ref, g3_ref, be3_ref,
                w4_ref, b4_ref,
                o_ref):
    # x_ref block: (N, Tp, L) ; o_ref block: (N, Tp, 1024)
    N, Tp, L = x_ref.shape
    M = N * Tp

    def linear_f32(h3, w_ref, b_ref):
        # f32 matmul on the MXU (used only for the tiny-K first layer).
        z = jnp.dot(h3.reshape(M, h3.shape[-1]), w_ref[...],
                    preferred_element_type=jnp.float32)
        return z.reshape(N, Tp, -1) + b_ref[...]

    def linear_bf16(h3, w_ref, b_ref):
        # Weights arrive pre-cast to bf16; only the activations are cast here.
        z = jnp.dot(h3.reshape(M, h3.shape[-1]).astype(MATMUL_DTYPE), w_ref[...],
                    preferred_element_type=jnp.float32)
        return z.reshape(N, Tp, -1) + b_ref[...]

    def bn_relu(z3, g_ref, be_ref):
        # Training-mode BatchNorm1d per point slice: stats over the N batch rows
        # (axis 0), biased variance, eps=1e-5.  Fused application: one FMA + max
        # over the big tensor instead of 4 elementwise passes.
        mean = jnp.mean(z3, axis=0, keepdims=True)                              # (1,Tp,C)
        var = jnp.maximum(jnp.mean(z3 * z3, axis=0, keepdims=True) - mean * mean,
                          0.0)                                                  # (1,Tp,C)
        scale = g_ref[...] * jax.lax.rsqrt(var + EPS)                           # (1,Tp,C)
        shift = be_ref[...] - mean * scale                                      # (1,Tp,C)
        return jnp.maximum(z3 * scale + shift, 0.0)

    x = x_ref[...].astype(jnp.float32)                                          # (N,Tp,L)
    h = bn_relu(linear_f32(x, w1_ref, b1_ref), g1_ref, be1_ref)                 # (N,Tp,64)
    h = bn_relu(linear_bf16(h, w2_ref, b2_ref), g2_ref, be2_ref)                # (N,Tp,128)
    h = bn_relu(linear_bf16(h, w3_ref, b3_ref), g3_ref, be3_ref)                # (N,Tp,128)
    out = linear_bf16(h, w4_ref, b4_ref)                                        # (N,Tp,1024)

    o_ref[...] = out.astype(o_ref.dtype)


def _full_spec(shape):
    # Whole-array block, independent of the grid position: the block index never
    # changes, so Pallas does not re-issue the weight DMA across grid steps.
    n = len(shape)
    return pl.BlockSpec(shape, lambda p, _n=n: (0,) * _n)


def _vmem_capacity_bytes():
    try:
        return int(pltpu.get_tpu_info().vmem_capacity_bytes)
    except Exception:
        return 64 * 1024 * 1024  # conservative default (v7x-sized VMEM)


def _choose_tp(N, P, target_rows):
    """Point-slices per grid step: Tp*N ~ target_rows (fills the MXU M dim),
    Tp a multiple of 8 (sublane tiling) or equal to P.  Keeps >= 2 grid steps
    when P allows so v7x's 2 TensorCores both get work."""
    tp = max(1, target_rows // max(N, 1))
    tp = max(8, (tp // 8) * 8)
    if tp >= P:
        tp = P
        if P >= 16:
            half = (((P + 1) // 2 + 7) // 8) * 8
            if 8 <= half < P:
                tp = half
    return tp


@partial(jax.jit, static_argnames=("out_dtype",))
def mlp_forward(x, params, out_dtype=jnp.float32):
    """x: (N, P, L) float32  ->  (N, P, 1024) out_dtype (default float32).
    Set out_dtype=jnp.bfloat16 to halve output HBM traffic (semantics change)."""
    N, P, L = x.shape
    (w1, b1, g1, be1,
     w2, b2, g2, be2,
     w3, b3, g3, be3,
     w4, b4) = params

    # Pre-cast the big matmul weights once; the kernel never re-casts per step.
    w2 = w2.astype(MATMUL_DTYPE)
    w3 = w3.astype(MATMUL_DTYPE)
    w4 = w4.astype(MATMUL_DTYPE)

    # Generation-aware budget: 128 MiB VMEM chips (v5e/v6e) get bigger blocks
    # and a higher scoped-VMEM limit than 64 MiB chips (v7x).
    vmem_cap = _vmem_capacity_bytes()
    big_vmem = vmem_cap >= 100 * 1024 * 1024
    target_rows = 2048 if big_vmem else 1024
    vmem_limit = (96 if big_vmem else 48) * 1024 * 1024

    # Guard: the minimal (N, 8, 1024) f32 output block (double-buffered) must fit.
    min_tp = 8 if P >= 8 else P
    if N * min_tp * 1024 * 4 * 2 > vmem_limit // 2:
        # TODO(synk): support very large batch N via two-pass (sum/sumsq) BatchNorm
        # accumulated over an N grid axis instead of a single resident block.
        raise NotImplementedError(
            "batch dimension too large for single-block BatchNorm kernel")

    tp = _choose_tp(N, P, target_rows)

    param_list = [w1, b1, g1, be1, w2, b2, g2, be2, w3, b3, g3, be3, w4, b4]
    in_specs = [pl.BlockSpec((N, tp, L), lambda p: (0, p, 0))]
    in_specs += [_full_spec(prm.shape) for prm in param_list]

    # out_shape is exactly (N, P, 1024): a ragged last point-tile is handled by
    # Pallas boundary-block masking, so there is no wrapper-side pad/slice pass
    # over the dominant output array.
    return pl.pallas_call(
        _mlp_kernel,
        out_shape=jax.ShapeDtypeStruct((N, P, 1024), out_dtype),
        grid_spec=pltpu.PrefetchScalarGridSpec(
            num_scalar_prefetch=0,
            grid=(pl.cdiv(P, tp),),
            in_specs=in_specs,
            out_specs=pl.BlockSpec((N, tp, 1024), lambda p: (0, p, 0)),
        ),
        compiler_params=pltpu.CompilerParams(
            dimension_semantics=("parallel",),
            vmem_limit_bytes=vmem_limit,
        ),
    )(x, *param_list)


def init_params(key, channels=3):
    """Deterministic init matching the PyTorch module's shapes.
    Linear weights stored pre-transposed as (in, out); biases as (1, out).
    BatchNorm gamma=1, beta=0 (PyTorch defaults).  All f32."""
    dims = [(channels, 64), (64, 128), (128, 128), (128, 1024)]
    keys = jax.random.split(key, 2 * len(dims))
    params = []
    for i, (fan_in, fan_out) in enumerate(dims):
        bound = 1.0 / jnp.sqrt(jnp.float32(fan_in))
        w = jax.random.uniform(keys[2 * i], (fan_in, fan_out),
                               minval=-bound, maxval=bound, dtype=jnp.float32)
        b = jax.random.uniform(keys[2 * i + 1], (1, fan_out),
                               minval=-bound, maxval=bound, dtype=jnp.float32)
        params.append(w)
        params.append(b)
        if i < 3:  # BN only on the first three layers (batchnorm1024 unused)
            params.append(jnp.ones((1, fan_out), jnp.float32))    # gamma
            params.append(jnp.zeros((1, fan_out), jnp.float32))   # beta
    return tuple(params)


def reference_forward(x, params, matmul_dtype=jnp.float32):
    """Pure-JAX reference mirroring the PyTorch forward (training-mode BN).
    matmul_dtype lets us mirror the kernel's bf16-at-the-dot policy on layers 2-4."""
    (w1, b1, g1, be1, w2, b2, g2, be2, w3, b3, g3, be3, w4, b4) = params

    def dot(a, w):
        return jnp.dot(a.astype(matmul_dtype), w.astype(matmul_dtype),
                       preferred_element_type=jnp.float32)

    def bn_relu(h, g, be):
        mean = jnp.mean(h, axis=0, keepdims=True)
        var = jnp.mean(jnp.square(h - mean), axis=0, keepdims=True)
        return jnp.maximum((h - mean) * jax.lax.rsqrt(var + EPS) * g + be, 0.0)

    def one_slice(xs):  # xs: (N, L)
        h = bn_relu(xs @ w1 + b1, g1, be1)          # layer 1 in f32 (matches kernel)
        h = bn_relu(dot(h, w2) + b2, g2, be2)
        h = bn_relu(dot(h, w3) + b3, g3, be3)
        return dot(h, w4) + b4

    outs = [one_slice(x[:, i, :]) for i in range(x.shape[1])]
    return jnp.stack(outs, axis=1)  # (N, P, 1024)


if __name__ == "__main__":
    key = jax.random.PRNGKey(0)
    k_x, k_p = jax.random.split(key)

    channels = 3
    params = init_params(k_p, channels=channels)

    # Case 1: small shapes, P an exact multiple of the point tile (grid of 2).
    N, P = 8, 16
    x = jax.random.normal(k_x, (N, P, channels), dtype=jnp.float32)
    out = jax.block_until_ready(mlp_forward(x, params))
    assert out.shape == (N, P, 1024), out.shape

    # Structural check vs. a reference that mirrors the kernel's bf16-dot policy.
    ref_mixed = reference_forward(x, params, matmul_dtype=MATMUL_DTYPE)
    err_mixed = float(jnp.max(jnp.abs(out - ref_mixed)))
    assert jnp.allclose(out, ref_mixed, atol=3e-2, rtol=3e-2), err_mixed

    # Semantics check vs. the strict-f32 PyTorch-style forward (bf16 MXU casts on
    # layers 2-4 are the only deliberate numerical difference).
    ref_f32 = reference_forward(x, params, matmul_dtype=jnp.float32)
    err_f32 = float(jnp.max(jnp.abs(out - ref_f32)))
    assert jnp.allclose(out, ref_f32, atol=1e-1, rtol=1e-1), err_f32

    # Case 2: ragged point axis (P % tile != 0) — boundary block masked by Pallas,
    # no wrapper-side pad/slice pass over the output.
    P2 = 20
    x2 = jax.random.normal(jax.random.PRNGKey(1), (N, P2, channels), dtype=jnp.float32)
    out2 = jax.block_until_ready(mlp_forward(x2, params))
    assert out2.shape == (N, P2, 1024), out2.shape
    ref2 = reference_forward(x2, params, matmul_dtype=jnp.float32)
    err2 = float(jnp.max(jnp.abs(out2 - ref2)))
    assert jnp.allclose(out2, ref2, atol=1e-1, rtol=1e-1), err2

    print("KERNEL_OK")
</pallas_src>

<mosaic_0001>
module attributes {stable_mosaic.version = 11 : i64} {
  func.func @_mlp_kernel(%arg0: i32, %arg1: memref<8x8x3xf32, #tpu.memory_space<vmem>>, %arg2: memref<3x64xf32, #tpu.memory_space<vmem>>, %arg3: memref<1x64xf32, #tpu.memory_space<vmem>>, %arg4: memref<1x64xf32, #tpu.memory_space<vmem>>, %arg5: memref<1x64xf32, #tpu.memory_space<vmem>>, %arg6: memref<64x128xbf16, #tpu.memory_space<vmem>>, %arg7: memref<1x128xf32, #tpu.memory_space<vmem>>, %arg8: memref<1x128xf32, #tpu.memory_space<vmem>>, %arg9: memref<1x128xf32, #tpu.memory_space<vmem>>, %arg10: memref<128x128xbf16, #tpu.memory_space<vmem>>, %arg11: memref<1x128xf32, #tpu.memory_space<vmem>>, %arg12: memref<1x128xf32, #tpu.memory_space<vmem>>, %arg13: memref<1x128xf32, #tpu.memory_space<vmem>>, %arg14: memref<128x1024xbf16, #tpu.memory_space<vmem>>, %arg15: memref<1x1024xf32, #tpu.memory_space<vmem>>, %arg16: memref<8x8x1024xf32, #tpu.memory_space<vmem>>) attributes {dimension_semantics = [#tpu.dimension_semantics<parallel>], iteration_bounds = array<i64: 2>, scalar_prefetch = 0 : i64, scratch_operands = 0 : i64, tpu.core_type = #tpu.core_type<tc>, window_params = [{transform_indices = @transform_0, window_bounds = array<i64: 8, 8, 3>}, {pipeline_mode = #tpu.pipeline_mode<synchronous>, transform_indices = @transform_1, window_bounds = array<i64: 3, 64>}, {pipeline_mode = #tpu.pipeline_mode<synchronous>, transform_indices = @transform_2, window_bounds = array<i64: 1, 64>}, {pipeline_mode = #tpu.pipeline_mode<synchronous>, transform_indices = @transform_3, window_bounds = array<i64: 1, 64>}, {pipeline_mode = #tpu.pipeline_mode<synchronous>, transform_indices = @transform_4, window_bounds = array<i64: 1, 64>}, {pipeline_mode = #tpu.pipeline_mode<synchronous>, transform_indices = @transform_5, window_bounds = array<i64: 64, 128>}, {pipeline_mode = #tpu.pipeline_mode<synchronous>, transform_indices = @transform_6, window_bounds = array<i64: 1, 128>}, {pipeline_mode = #tpu.pipeline_mode<synchronous>, transform_indices = @transform_7, window_bounds = array<i64: 1, 128>}, {pipeline_mode = #tpu.pipeline_mode<synchronous>, transform_indices = @transform_8, window_bounds = array<i64: 1, 128>}, {pipeline_mode = #tpu.pipeline_mode<synchronous>, transform_indices = @transform_9, window_bounds = array<i64: 128, 128>}, {pipeline_mode = #tpu.pipeline_mode<synchronous>, transform_indices = @transform_10, window_bounds = array<i64: 1, 128>}, {pipeline_mode = #tpu.pipeline_mode<synchronous>, transform_indices = @transform_11, window_bounds = array<i64: 1, 128>}, {pipeline_mode = #tpu.pipeline_mode<synchronous>, transform_indices = @transform_12, window_bounds = array<i64: 1, 128>}, {pipeline_mode = #tpu.pipeline_mode<synchronous>, transform_indices = @transform_13, window_bounds = array<i64: 128, 1024>}, {pipeline_mode = #tpu.pipeline_mode<synchronous>, transform_indices = @transform_14, window_bounds = array<i64: 1, 1024>}, {transform_indices = @transform_15, window_bounds = array<i64: 8, 8, 1024>}]} {
    %c0 = arith.constant 0 : index
    %c0_0 = arith.constant 0 : index
    %c0_1 = arith.constant 0 : index
    %0 = vector.load %arg1[%c0, %c0_0, %c0_1] : memref<8x8x3xf32, #tpu.memory_space<vmem>>, vector<8x8x3xf32>
    %1 = vector.shape_cast %0 : vector<8x8x3xf32> to vector<64x3xf32>
    %c0_2 = arith.constant 0 : index
    %c0_3 = arith.constant 0 : index
    %2 = vector.load %arg2[%c0_2, %c0_3] : memref<3x64xf32, #tpu.memory_space<vmem>>, vector<3x64xf32>
    %cst = arith.constant dense<0.000000e+00> : vector<64x64xf32>
    %3 = tpu.matmul %1, %2, %cst {dimension_numbers = #tpu.dot_dimension_numbers<[1], [0], [0], [1], [0, 0, 1, 1], [], []>} : vector<64x3xf32>, vector<3x64xf32>, vector<64x64xf32> -> vector<64x64xf32>
    %4 = vector.shape_cast %3 : vector<64x64xf32> to vector<8x8x64xf32>
    %c0_4 = arith.constant 0 : index
    %c0_5 = arith.constant 0 : index
    %5 = vector.load %arg3[%c0_4, %c0_5] : memref<1x64xf32, #tpu.memory_space<vmem>>, vector<1x64xf32>
    %6 = vector.shape_cast %5 : vector<1x64xf32> to vector<1x1x64xf32>
    %7 = vector.broadcast %6 : vector<1x1x64xf32> to vector<8x8x64xf32>
    %8 = arith.addf %4, %7 : vector<8x8x64xf32>
    %cst_6 = arith.constant dense<0.000000e+00> : vector<8x64xf32>
    %9 = vector.multi_reduction <add>, %8, %cst_6 [0] : vector<8x8x64xf32> to vector<8x64xf32>
    %10 = vector.shape_cast %9 : vector<8x64xf32> to vector<1x8x64xf32>
    %cst_7 = arith.constant 8.000000e+00 : f32
    %11 = vector.broadcast %cst_7 : f32 to vector<1x8x64xf32>
    %12 = arith.divf %10, %11 : vector<1x8x64xf32>
    %13 = arith.mulf %8, %8 : vector<8x8x64xf32>
    %cst_8 = arith.constant dense<0.000000e+00> : vector<8x64xf32>
    %14 = vector.multi_reduction <add>, %13, %cst_8 [0] : vector<8x8x64xf32> to vector<8x64xf32>
    %15 = vector.shape_cast %14 : vector<8x64xf32> to vector<1x8x64xf32>
    %cst_9 = arith.constant 8.000000e+00 : f32
    %16 = vector.broadcast %cst_9 : f32 to vector<1x8x64xf32>
    %17 = arith.divf %15, %16 : vector<1x8x64xf32>
    %18 = arith.mulf %12, %12 : vector<1x8x64xf32>
    %19 = arith.subf %17, %18 : vector<1x8x64xf32>
    %cst_10 = arith.constant 0.000000e+00 : f32
    %20 = vector.broadcast %cst_10 : f32 to vector<1x8x64xf32>
    %21 = arith.maximumf %19, %20 : vector<1x8x64xf32>
    %c0_11 = arith.constant 0 : index
    %c0_12 = arith.constant 0 : index
    %22 = vector.load %arg4[%c0_11, %c0_12] : memref<1x64xf32, #tpu.memory_space<vmem>>, vector<1x64xf32>
    %cst_13 = arith.constant 9.99999974E-6 : f32
    %23 = vector.broadcast %cst_13 : f32 to vector<1x8x64xf32>
    %24 = arith.addf %21, %23 : vector<1x8x64xf32>
    %25 = math.rsqrt %24 : vector<1x8x64xf32>
    %26 = vector.shape_cast %22 : vector<1x64xf32> to vector<1x1x64xf32>
    %27 = vector.broadcast %26 : vector<1x1x64xf32> to vector<1x8x64xf32>
    %28 = arith.mulf %27, %25 : vector<1x8x64xf32>
    %c0_14 = arith.constant 0 : index
    %c0_15 = arith.constant 0 : index
    %29 = vector.load %arg5[%c0_14, %c0_15] : memref<1x64xf32, #tpu.memory_space<vmem>>, vector<1x64xf32>
    %30 = arith.mulf %12, %28 : vector<1x8x64xf32>
    %31 = vector.shape_cast %29 : vector<1x64xf32> to vector<1x1x64xf32>
    %32 = vector.broadcast %31 : vector<1x1x64xf32> to vector<1x8x64xf32>
    %33 = arith.subf %32, %30 : vector<1x8x64xf32>
    %34 = vector.broadcast %28 : vector<1x8x64xf32> to vector<8x8x64xf32>
    %35 = arith.mulf %8, %34 : vector<8x8x64xf32>
    %36 = vector.broadcast %33 : vector<1x8x64xf32> to vector<8x8x64xf32>
    %37 = arith.addf %35, %36 : vector<8x8x64xf32>
    %cst_16 = arith.constant 0.000000e+00 : f32
    %38 = vector.broadcast %cst_16 : f32 to vector<8x8x64xf32>
    %39 = arith.maximumf %37, %38 : vector<8x8x64xf32>
    %40 = vector.shape_cast %39 : vector<8x8x64xf32> to vector<64x64xf32>
    %41 = arith.truncf %40 : vector<64x64xf32> to vector<64x64xbf16>
    %c0_17 = arith.constant 0 : index
    %c0_18 = arith.constant 0 : index
    %42 = vector.load %arg6[%c0_17, %c0_18] : memref<64x128xbf16, #tpu.memory_space<vmem>>, vector<64x128xbf16>
    %cst_19 = arith.constant dense<0.000000e+00> : vector<64x128xf32>
    %43 = tpu.matmul %41, %42, %cst_19 {dimension_numbers = #tpu.dot_dimension_numbers<[1], [0], [0], [1], [0, 0, 1, 1], [], []>} : vector<64x64xbf16>, vector<64x128xbf16>, vector<64x128xf32> -> vector<64x128xf32>
    %44 = vector.shape_cast %43 : vector<64x128xf32> to vector<8x8x128xf32>
    %c0_20 = arith.constant 0 : index
    %c0_21 = arith.constant 0 : index
    %45 = vector.load %arg7[%c0_20, %c0_21] : memref<1x128xf32, #tpu.memory_space<vmem>>, vector<1x128xf32>
    %46 = vector.shape_cast %45 : vector<1x128xf32> to vector<1x1x128xf32>
    %47 = vector.broadcast %46 : vector<1x1x128xf32> to vector<8x8x128xf32>
    %48 = arith.addf %44, %47 : vector<8x8x128xf32>
    %cst_22 = arith.constant dense<0.000000e+00> : vector<8x128xf32>
    %49 = vector.multi_reduction <add>, %48, %cst_22 [0] : vector<8x8x128xf32> to vector<8x128xf32>
    %50 = vector.shape_cast %49 : vector<8x128xf32> to vector<1x8x128xf32>
    %cst_23 = arith.constant 8.000000e+00 : f32
    %51 = vector.broadcast %cst_23 : f32 to vector<1x8x128xf32>
    %52 = arith.divf %50, %51 : vector<1x8x128xf32>
    %53 = arith.mulf %48, %48 : vector<8x8x128xf32>
    %cst_24 = arith.constant dense<0.000000e+00> : vector<8x128xf32>
    %54 = vector.multi_reduction <add>, %53, %cst_24 [0] : vector<8x8x128xf32> to vector<8x128xf32>
    %55 = vector.shape_cast %54 : vector<8x128xf32> to vector<1x8x128xf32>
    %cst_25 = arith.constant 8.000000e+00 : f32
    %56 = vector.broadcast %cst_25 : f32 to vector<1x8x128xf32>
    %57 = arith.divf %55, %56 : vector<1x8x128xf32>
    %58 = arith.mulf %52, %52 : vector<1x8x128xf32>
    %59 = arith.subf %57, %58 : vector<1x8x128xf32>
    %cst_26 = arith.constant 0.000000e+00 : f32
    %60 = vector.broadcast %cst_26 : f32 to vector<1x8x128xf32>
    %61 = arith.maximumf %59, %60 : vector<1x8x128xf32>
    %c0_27 = arith.constant 0 : index
    %c0_28 = arith.constant 0 : index
    %62 = vector.load %arg8[%c0_27, %c0_28] : memref<1x128xf32, #tpu.memory_space<vmem>>, vector<1x128xf32>
    %cst_29 = arith.constant 9.99999974E-6 : f32
    %63 = vector.broadcast %cst_29 : f32 to vector<1x8x128xf32>
    %64 = arith.addf %61, %63 : vector<1x8x128xf32>
    %65 = math.rsqrt %64 : vector<1x8x128xf32>
    %66 = vector.shape_cast %62 : vector<1x128xf32> to vector<1x1x128xf32>
    %67 = vector.broadcast %66 : vector<1x1x128xf32> to vector<1x8x128xf32>
    %68 = arith.mulf %67, %65 : vector<1x8x128xf32>
    %c0_30 = arith.constant 0 : index
    %c0_31 = arith.constant 0 : index
    %69 = vector.load %arg9[%c0_30, %c0_31] : memref<1x128xf32, #tpu.memory_space<vmem>>, vector<1x128xf32>
    %70 = arith.mulf %52, %68 : vector<1x8x128xf32>
    %71 = vector.shape_cast %69 : vector<1x128xf32> to vector<1x1x128xf32>
    %72 = vector.broadcast %71 : vector<1x1x128xf32> to vector<1x8x128xf32>
    %73 = arith.subf %72, %70 : vector<1x8x128xf32>
    %74 = vector.broadcast %68 : vector<1x8x128xf32> to vector<8x8x128xf32>
    %75 = arith.mulf %48, %74 : vector<8x8x128xf32>
    %76 = vector.broadcast %73 : vector<1x8x128xf32> to vector<8x8x128xf32>
    %77 = arith.addf %75, %76 : vector<8x8x128xf32>
    %cst_32 = arith.constant 0.000000e+00 : f32
    %78 = vector.broadcast %cst_32 : f32 to vector<8x8x128xf32>
    %79 = arith.maximumf %77, %78 : vector<8x8x128xf32>
    %80 = vector.shape_cast %79 : vector<8x8x128xf32> to vector<64x128xf32>
    %81 = arith.truncf %80 : vector<64x128xf32> to vector<64x128xbf16>
    %c0_33 = arith.constant 0 : index
    %c0_34 = arith.constant 0 : index
    %82 = vector.load %arg10[%c0_33, %c0_34] : memref<128x128xbf16, #tpu.memory_space<vmem>>, vector<128x128xbf16>
    %cst_35 = arith.constant dense<0.000000e+00> : vector<64x128xf32>
    %83 = tpu.matmul %81, %82, %cst_35 {dimension_numbers = #tpu.dot_dimension_numbers<[1], [0], [0], [1], [0, 0, 1, 1], [], []>} : vector<64x128xbf16>, vector<128x128xbf16>, vector<64x128xf32> -> vector<64x128xf32>
    %84 = vector.shape_cast %83 : vector<64x128xf32> to vector<8x8x128xf32>
    %c0_36 = arith.constant 0 : index
    %c0_37 = arith.constant 0 : index
    %85 = vector.load %arg11[%c0_36, %c0_37] : memref<1x128xf32, #tpu.memory_space<vmem>>, vector<1x128xf32>
    %86 = vector.shape_cast %85 : vector<1x128xf32> to vector<1x1x128xf32>
    %87 = vector.broadcast %86 : vector<1x1x128xf32> to vector<8x8x128xf32>
    %88 = arith.addf %84, %87 : vector<8x8x128xf32>
    %cst_38 = arith.constant dense<0.000000e+00> : vector<8x128xf32>
    %89 = vector.multi_reduction <add>, %88, %cst_38 [0] : vector<8x8x128xf32> to vector<8x128xf32>
    %90 = vector.shape_cast %89 : vector<8x128xf32> to vector<1x8x128xf32>
    %cst_39 = arith.constant 8.000000e+00 : f32
    %91 = vector.broadcast %cst_39 : f32 to vector<1x8x128xf32>
    %92 = arith.divf %90, %91 : vector<1x8x128xf32>
    %93 = arith.mulf %88, %88 : vector<8x8x128xf32>
    %cst_40 = arith.constant dense<0.000000e+00> : vector<8x128xf32>
    %94 = vector.multi_reduction <add>, %93, %cst_40 [0] : vector<8x8x128xf32> to vector<8x128xf32>
    %95 = vector.shape_cast %94 : vector<8x128xf32> to vector<1x8x128xf32>
    %cst_41 = arith.constant 8.000000e+00 : f32
    %96 = vector.broadcast %cst_41 : f32 to vector<1x8x128xf32>
    %97 = arith.divf %95, %96 : vector<1x8x128xf32>
    %98 = arith.mulf %92, %92 : vector<1x8x128xf32>
    %99 = arith.subf %97, %98 : vector<1x8x128xf32>
    %cst_42 = arith.constant 0.000000e+00 : f32
    %100 = vector.broadcast %cst_42 : f32 to vector<1x8x128xf32>
    %101 = arith.maximumf %99, %100 : vector<1x8x128xf32>
    %c0_43 = arith.constant 0 : index
    %c0_44 = arith.constant 0 : index
    %102 = vector.load %arg12[%c0_43, %c0_44] : memref<1x128xf32, #tpu.memory_space<vmem>>, vector<1x128xf32>
    %cst_45 = arith.constant 9.99999974E-6 : f32
    %103 = vector.broadcast %cst_45 : f32 to vector<1x8x128xf32>
    %104 = arith.addf %101, %103 : vector<1x8x128xf32>
    %105 = math.rsqrt %104 : vector<1x8x128xf32>
    %106 = vector.shape_cast %102 : vector<1x128xf32> to vector<1x1x128xf32>
    %107 = vector.broadcast %106 : vector<1x1x128xf32> to vector<1x8x128xf32>
    %108 = arith.mulf %107, %105 : vector<1x8x128xf32>
    %c0_46 = arith.constant 0 : index
    %c0_47 = arith.constant 0 : index
    %109 = vector.load %arg13[%c0_46, %c0_47] : memref<1x128xf32, #tpu.memory_space<vmem>>, vector<1x128xf32>
    %110 = arith.mulf %92, %108 : vector<1x8x128xf32>
    %111 = vector.shape_cast %109 : vector<1x128xf32> to vector<1x1x128xf32>
    %112 = vector.broadcast %111 : vector<1x1x128xf32> to vector<1x8x128xf32>
    %113 = arith.subf %112, %110 : vector<1x8x128xf32>
    %114 = vector.broadcast %108 : vector<1x8x128xf32> to vector<8x8x128xf32>
    %115 = arith.mulf %88, %114 : vector<8x8x128xf32>
    %116 = vector.broadcast %113 : vector<1x8x128xf32> to vector<8x8x128xf32>
    %117 = arith.addf %115, %116 : vector<8x8x128xf32>
    %cst_48 = arith.constant 0.000000e+00 : f32
    %118 = vector.broadcast %cst_48 : f32 to vector<8x8x128xf32>
    %119 = arith.maximumf %117, %118 : vector<8x8x128xf32>
    %120 = vector.shape_cast %119 : vector<8x8x128xf32> to vector<64x128xf32>
    %121 = arith.truncf %120 : vector<64x128xf32> to vector<64x128xbf16>
    %c0_49 = arith.constant 0 : index
    %c0_50 = arith.constant 0 : index
    %122 = vector.load %arg14[%c0_49, %c0_50] : memref<128x1024xbf16, #tpu.memory_space<vmem>>, vector<128x1024xbf16>
    %cst_51 = arith.constant dense<0.000000e+00> : vector<64x1024xf32>
    %123 = tpu.matmul %121, %122, %cst_51 {dimension_numbers = #tpu.dot_dimension_numbers<[1], [0], [0], [1], [0, 0, 1, 1], [], []>} : vector<64x128xbf16>, vector<128x1024xbf16>, vector<64x1024xf32> -> vector<64x1024xf32>
    %124 = vector.shape_cast %123 : vector<64x1024xf32> to vector<8x8x1024xf32>
    %c0_52 = arith.constant 0 : index
    %c0_53 = arith.constant 0 : index
    %125 = vector.load %arg15[%c0_52, %c0_53] : memref<1x1024xf32, #tpu.memory_space<vmem>>, vector<1x1024xf32>
    %126 = vector.shape_cast %125 : vector<1x1024xf32> to vector<1x1x1024xf32>
    %127 = vector.broadcast %126 : vector<1x1x1024xf32> to vector<8x8x1024xf32>
    %128 = arith.addf %124, %127 : vector<8x8x1024xf32>
    %c0_54 = arith.constant 0 : index
    %c0_55 = arith.constant 0 : index
    %c0_56 = arith.constant 0 : index
    %129 = vector.load %arg16[%c0_54, %c0_55, %c0_56] : memref<8x8x1024xf32, #tpu.memory_space<vmem>>, vector<8x8x1024xf32>
    tpu.vector_store %arg16[%c0_54, %c0_55, %c0_56], %128 {strides = array<i32>} : memref<8x8x1024xf32, #tpu.memory_space<vmem>>, vector<8x8x1024xf32>,
    return
  }
  func.func @transform_0(%arg0: i32) -> (i32, i32, i32) {
    %c0_i32 = arith.constant 0 : i32
    %c0_i32_0 = arith.constant 0 : i32
    %c0_i32_1 = arith.constant 0 : i32
    return %c0_i32, %arg0, %c0_i32_0 : i32, i32, i32
  }
  func.func @transform_1(%arg0: i32) -> (i32, i32) {
    %c0_i32 = arith.constant 0 : i32
    %c0_i32_0 = arith.constant 0 : i32
    %c0_i32_1 = arith.constant 0 : i32
    return %c0_i32, %c0_i32_0 : i32, i32
  }
  func.func @transform_2(%arg0: i32) -> (i32, i32) {
    %c0_i32 = arith.constant 0 : i32
    %c0_i32_0 = arith.constant 0 : i32
    %c0_i32_1 = arith.constant 0 : i32
    return %c0_i32, %c0_i32_0 : i32, i32
  }
  func.func @transform_3(%arg0: i32) -> (i32, i32) {
    %c0_i32 = arith.constant 0 : i32
    %c0_i32_0 = arith.constant 0 : i32
    %c0_i32_1 = arith.constant 0 : i32
    return %c0_i32, %c0_i32_0 : i32, i32
  }
  func.func @transform_4(%arg0: i32) -> (i32, i32) {
    %c0_i32 = arith.constant 0 : i32
    %c0_i32_0 = arith.constant 0 : i32
    %c0_i32_1 = arith.constant 0 : i32
    return %c0_i32, %c0_i32_0 : i32, i32
  }
  func.func @transform_5(%arg0: i32) -> (i32, i32) {
    %c0_i32 = arith.constant 0 : i32
    %c0_i32_0 = arith.constant 0 : i32
    %c0_i32_1 = arith.constant 0 : i32
    return %c0_i32, %c0_i32_0 : i32, i32
  }
  func.func @transform_6(%arg0: i32) -> (i32, i32) {
    %c0_i32 = arith.constant 0 : i32
    %c0_i32_0 = arith.constant 0 : i32
    %c0_i32_1 = arith.constant 0 : i32
    return %c0_i32, %c0_i32_0 : i32, i32
  }
  func.func @transform_7(%arg0: i32) -> (i32, i32) {
    %c0_i32 = arith.constant 0 : i32
    %c0_i32_0 = arith.constant 0 : i32
    %c0_i32_1 = arith.constant 0 : i32
    return %c0_i32, %c0_i32_0 : i32, i32
  }
  func.func @transform_8(%arg0: i32) -> (i32, i32) {
    %c0_i32 = arith.constant 0 : i32
    %c0_i32_0 = arith.constant 0 : i32
    %c0_i32_1 = arith.constant 0 : i32
    return %c0_i32, %c0_i32_0 : i32, i32
  }
  func.func @transform_9(%arg0: i32) -> (i32, i32) {
    %c0_i32 = arith.constant 0 : i32
    %c0_i32_0 = arith.constant 0 : i32
    %c0_i32_1 = arith.constant 0 : i32
    return %c0_i32, %c0_i32_0 : i32, i32
  }
  func.func @transform_10(%arg0: i32) -> (i32, i32) {
    %c0_i32 = arith.constant 0 : i32
    %c0_i32_0 = arith.constant 0 : i32
    %c0_i32_1 = arith.constant 0 : i32
    return %c0_i32, %c0_i32_0 : i32, i32
  }
  func.func @transform_11(%arg0: i32) -> (i32, i32) {
    %c0_i32 = arith.constant 0 : i32
    %c0_i32_0 = arith.constant 0 : i32
    %c0_i32_1 = arith.constant 0 : i32
    return %c0_i32, %c0_i32_0 : i32, i32
  }
  func.func @transform_12(%arg0: i32) -> (i32, i32) {
    %c0_i32 = arith.constant 0 : i32
    %c0_i32_0 = arith.constant 0 : i32
    %c0_i32_1 = arith.constant 0 : i32
    return %c0_i32, %c0_i32_0 : i32, i32
  }
  func.func @transform_13(%arg0: i32) -> (i32, i32) {
    %c0_i32 = arith.constant 0 : i32
    %c0_i32_0 = arith.constant 0 : i32
    %c0_i32_1 = arith.constant 0 : i32
    return %c0_i32, %c0_i32_0 : i32, i32
  }
  func.func @transform_14(%arg0: i32) -> (i32, i32) {
    %c0_i32 = arith.constant 0 : i32
    %c0_i32_0 = arith.constant 0 : i32
    %c0_i32_1 = arith.constant 0 : i32
    return %c0_i32, %c0_i32_0 : i32, i32
  }
  func.func @transform_15(%arg0: i32) -> (i32, i32, i32) {
    %c0_i32 = arith.constant 0 : i32
    %c0_i32_0 = arith.constant 0 : i32
    %c0_i32_1 = arith.constant 0 : i32
    return %c0_i32, %arg0, %c0_i32_0 : i32, i32, i32
  }
}

</mosaic_0001>

<bundles_post_ra>
// kernel: mlp_forward.1
= control target key start
LH: loop header
LB: loop body
LE: loop exit
PB: predicated region body
PF: predicated region fallthrough
CT: control target
= control target key end

     0   :  { %s3242_s0 = inlined_call_operand.vmem [shape: f32[8,16,3], index: 0, kind: input, shape index: {}]   ;;  %s3243_s1 = inlined_call_operand.vmem [shape: f32[3,64], index: 1, kind: input, shape index: {}]   ;;  %s3244_s2 = inlined_call_operand.vmem [shape: f32[1,64], index: 2, kind: input, shape index: {}]   ;;  %s3245_s3 = inlined_call_operand.vmem [shape: f32[1,64], index: 3, kind: input, shape index: {}]   ;;  %s3246_s4 = inlined_call_operand.vmem [shape: f32[1,64], index: 4, kind: input, shape index: {}]   ;;  %s3247_s5 = inlined_call_operand.vmem [shape: bf16[64,128], index: 5, kind: input, shape index: {}]   ;;  %s3248_s6 = inlined_call_operand.vmem [shape: f32[1,128], index: 6, kind: input, shape index: {}]   ;;  %s3249_s7 = inlined_call_operand.vmem [shape: f32[1,128], index: 7, kind: input, shape index: {}]   ;;  %s3250_s8 = inlined_call_operand.vmem [shape: f32[1,128], index: 8, kind: input, shape index: {}]   ;;  %s3251_s9 = inlined_call_operand.vmem [shape: bf16[128,128], index: 9, kind: input, shape index: {}]   ;;  %s3252_s10 = inlined_call_operand.vmem [shape: f32[1,128], index: 10, kind: input, shape index: {}]   ;;  %s3253_s11 = inlined_call_operand.vmem [shape: f32[1,128], index: 11, kind: input, shape index: {}]   ;;  %s3254_s12 = inlined_call_operand.vmem [shape: f32[1,128], index: 12, kind: input, shape index: {}]   ;;  %s3255_s13 = inlined_call_operand.vmem [shape: bf16[128,1024], index: 13, kind: input, shape index: {}]   ;;  %s3256_s14 = inlined_call_operand.vmem [shape: f32[1,1024], index: 14, kind: input, shape index: {}]   ;;  %s3257_s15 = inlined_call_operand.hbm [shape: f32[8,16,1024], index: 15, kind: output, shape index: {}]  }
   0x1   :  { %3259 = sst [smem:[#allocation6_spill]] %s3242_s0 }
   0x2   :  { %3260 = sst [smem:[#allocation7_spill]] %s3243_s1 }
   0x3   :  { %3261 = sst [smem:[#allocation8_spill]] %s3244_s2 }
   0x4   :  { %3262 = sst [smem:[#allocation9_spill]] %s3245_s3 }
   0x5   :  { %3263 = sst [smem:[#allocation10_spill]] %s3246_s4 }
   0x6   :  { %20 = vsyncpa [#allocation4], 0 }
   0x7   :  { %22 = vsyncpa [#allocation4 + $0x1], 0  ;;  %s2571_s18 = smov 0   ;;  %s2573_s19 = smov 0  }
   0x8   :  { %s2575_s20 = smov 0   ;;  %s2577_s21 = smov 0  }
   0x9 LB: > { %s3258_s22 = sadd.s32 4294967295, %s2484_s21   ;;  %s2150_s23 = sadd.s32 4294967294, %s2484_s21   ;;  %s2484_s21 = sphi %s2577_s21, %s3276_s21   ;;  %s2480_s20 = sphi %s2575_s20, %s3275_s20   ;;  %s2476_s19 = sphi %s2573_s19, %s3274_s19   ;;  %s2472_s18 = sphi %s2571_s18, %s3273_s18  }
   0xa   : > { %s2594_s24 = sadd.s32 1, %s2484_s21   ;;  %s35_s25 = sadd.s32 1, %s2480_s20 }
   0xb   : > { %s32_s26 = ssub.s32 %s2484_s21, %s2594_s24  ;;  %p42_p0 = scmp.ne.s32.totalorder %s2480_s20, %s2476_s19 }
   0xc   : > { %p33_p1 = scmp.eq.s32.totalorder %s32_s26, 0  ;;  %p43_p2 = scmp.eq.s32.totalorder %s2484_s21, 0 }
   0xd   : > { %p366_p3 = scmp.eq.s32.totalorder %s3258_s22, 1  ;;  %p371_p4 = scmp.ne.s32.totalorder %s2476_s19, %s2472_s18 }
   0xe   : > { %s2607_s27 = scalar_select %p33_p1, %s2480_s20, %s35_s25  }
   0xf   : > { %p44_p5 = por %p43_p2, %p42_p0  ;;  %p2609_p6 = por %p366_p3, %p42_p0 }
  0x10   : > { %p372_p7 = scmp.eq.s32.totalorder %s2150_s23, 1  ;;  %p2152_p9 = scmp.ge.s32.totalorder %s2484_s21, 2 }
  0x12   : > { %p2613_p8 = por %p372_p7, %p371_p4  ;;  %430 = sbr.rel (%p2152_p9) target bundleno = 39 (0x27), region = 72 }
  0x19   : > { %433 = sbr.rel (!%p44_p5) target bundleno = 39 (0x27), region = 76  ;;  %s435_s30 = sand.u32 (%p44_p5), 1, %s2480_s20  }
  0x1a   : > { %s2154_s16 = sshll.u32 (%p44_p5), %s2484_s21, 3  ;;  %s2153_s17 = sshll.u32 (%p44_p5), %s435_s30, 6 }
  0x1b   : > { %s3266_s0 = sld [smem:[#allocation6_spill]] (%p44_p5)  ;;  %s437_s23 = scalar_lea.vmem (%p44_p5), [#allocation2], %s2153_s17 }
  0x21   : > { %s439_s22 = scalar_lea.vmem %s3266_s0, %s2154_s16 }
  0x22   : > { %v481_v0 = vld [vmem:[%s439_s22] sm:$0xff]  ;;  %v483_v1 = vld [vmem:[%s439_s22 + $0x10] sm:$0xff] }
  0x23   : > { %v485_v2 = vld [vmem:[%s439_s22 + $0x20] sm:$0xff]  ;;  %482 = vst [vmem:[%s437_s23] sm:$0xff] %v481_v0  ;;  %484 = vst [vmem:[%s437_s23 + $0x8] sm:$0xff] %v483_v1  ;;  %v487_v3 = vld [vmem:[%s439_s22 + $0x30] sm:$0xff] }
  0x24   : > { %486 = vst [vmem:[%s437_s23 + $0x10] sm:$0xff] %v485_v2  ;;  %v489_v4 = vld [vmem:[%s439_s22 + $0x40] sm:$0xff]  ;;  %v491_v5 = vld [vmem:[%s439_s22 + $0x50] sm:$0xff]  ;;  %488 = vst [vmem:[%s437_s23 + $0x18] sm:$0xff] %v487_v3 }
  0x25   : > { %490 = vst [vmem:[%s437_s23 + $0x20] sm:$0xff] %v489_v4  ;;  %492 = vst [vmem:[%s437_s23 + $0x28] sm:$0xff] %v491_v5  ;;  %v493_v6 = vld [vmem:[%s439_s22 + $0x60] sm:$0xff]  ;;  %v495_v7 = vld [vmem:[%s439_s22 + $0x70] sm:$0xff] }
  0x26   : > { %494 = vst [vmem:[%s437_s23 + $0x30] sm:$0xff] %v493_v6  ;;  %496 = vst [vmem:[%s437_s23 + $0x38] sm:$0xff] %v495_v7 }
  0x27 PF: > { %p2155_p10 = scmp.ge.s32.totalorder %s2484_s21, 1  ;;  %p501_p11 = scmp.lt.s32.totalorder %s2484_s21, 3 }
  0x29   : > { %p502_p12 = pnand %p2155_p10, %p501_p11 }
  0x2a   : > { %s3267_s1 = sld [smem:[#allocation7_spill]] (!%p502_p12)  ;;  %vm590_vm0 = vcmask (!%p502_p12), 1042432   ;;  %s2631_s17 = sand.u32 (!%p502_p12), 1, %s2476_s19   ;;  %vm565_vm1 = vcmask (!%p502_p12), 23552   ;;  %v2404_v17 = vld [vmem:[%s3247_s5] sm:$0xff] (!%p502_p12)   ;;  %v2405_v18 = vld [vmem:[%s3247_s5 + $0x8] sm:$0xff] (!%p502_p12)  }
  0x2b   : > { %505 = sbr.rel (%p502_p12) target bundleno = 1143 (0x477), region = 114  ;;  %s2156_s22 = sshll.u32 (!%p502_p12), %s2631_s17, 6  ;;  %2305 = vmatprep.subr.bf16.mxu1 (!%p502_p12), %v2404_v17  ;;  %v2406_v19 = vld [vmem:[%s3247_s5 + $0x10] sm:$0xff] (!%p502_p12)   ;;  %v2407_v20 = vld [vmem:[%s3247_s5 + $0x18] sm:$0xff] (!%p502_p12)   ;;  %vm714_vm2 = vcmask (!%p502_p12), 523264  }
  0x2c   : > { %s510_s25 = scalar_lea.vmem (!%p502_p12), [#allocation2], %s2156_s22  ;;  %2306 = vmatpush3.bf16.msra.mxu1 (!%p502_p12), %v2404_v17  ;;  %s3268_s2 = sld [smem:[#allocation8_spill]] (!%p502_p12) }
  0x2d   : > { %v556_v9 = vld [vmem:[%s510_s25] sm:$0xff] (!%p502_p12)  ;;  %v557_v10 = vld [vmem:[%s510_s25 + $0x8] sm:$0xff] (!%p502_p12)  ;;  %v558_v11 = vld [vmem:[%s510_s25 + $0x10] sm:$0xff] (!%p502_p12)  ;;  %2307 = vmatprep.subr.bf16.mxu1 (!%p502_p12), %v2405_v18  ;;  %s3269_s3 = sld [smem:[#allocation9_spill]] (!%p502_p12)  ;;  %s3270_s4 = sld [smem:[#allocation10_spill]] (!%p502_p12) }
  0x2e   : > { %2293 = vmatprep.mubr.msk.f32.mxu0 (!%p502_p12), %vm565_vm1, %v556_v9  ;;  %v559_v12 = vld [vmem:[%s510_s25 + $0x18] sm:$0xff] (!%p502_p12)  ;;  %v560_v13 = vld [vmem:[%s510_s25 + $0x20] sm:$0xff] (!%p502_p12)  ;;  %v561_v14 = vld [vmem:[%s510_s25 + $0x28] sm:$0xff] (!%p502_p12)  ;;  %s2157_s30 = sshll.u32 (!%p502_p12), %s2631_s17, 9 }
  0x2f   : > { %v562_v15 = vld [vmem:[%s510_s25 + $0x30] sm:$0xff] (!%p502_p12)  ;;  %v563_v16 = vld [vmem:[%s510_s25 + $0x38] sm:$0xff] (!%p502_p12)  ;;  %s3048_s16 = scalar_lea.vmem (!%p502_p12), [#allocation3], %s2157_s30  ;;  %s2487_s30 = smov (!%p502_p12), [#allocation3]  }
  0x30   : > { %v564_v8 = vld [vmem:[%s3267_s1] sm:$0x7] (!%p502_p12)  ;;  %2308 = vmatpush3.bf16.msra.mxu1 (!%p502_p12), %v2405_v18  ;;  %s2082_s22 = sshll.u32 (!%p502_p12), %s3048_s16, 4  ;;  %s3194_s22 = int_to_ptr.vmem [resolvable:$true] %s2082_s22 }
  0x31   : > { %2291 = vmatprep.subr.msk.mxu0 (!%p502_p12), %vm590_vm0, %v564_v8  ;;  %2309 = vmatprep.subr.bf16.mxu1 (!%p502_p12), %v2406_v19  ;;  %s2422_s1 = scalar_lea.vmem (!%p502_p12), %s3194_s22, 8192 }
  0x32   : > { %2292 = vmatpush3.msk.msra.mxu0 %vm590_vm0, %v564_v8  ;;  %v2167_v21 = vld [vmem:[%s3268_s2] ss:$0 sm:$0xff]  ;;  %s3271_s2 = sadd.s32 4294967295, %s2484_s21   ;;  %p2423_p13 = scmp.ne.s32.totalorder %s3194_s22, %s2422_s1 }
  0x33   : > { %2294 = vmatmul.mubr.msk.f32.vlgmr.msra.gmra.mrb[0].mxu0 %vm565_vm1, %v557_v10  ;;  %v2168_v18 = vld [vmem:[%s3269_s3] ss:$0 sm:$0xff]  ;;  %s2261_s3 = sshll.u32 %s3271_s2, 10  ;;  %s2426_s2 = sshll.u32 %s2487_s30, 4  ;;  %s2427_s2 = int_to_ptr.vmem [resolvable:$false] %s2426_s2 }
  0x34   : > { %2296 = vmatprep.mubr.msk.f32.mxu0 %vm565_vm1, %v558_v11  ;;  %2310 = vmatpush3.bf16.msra.mxu1 %v2406_v19  ;;  %s3190_s23 = scalar_lea.hbm %s3257_s15, %s2261_s3  ;;  %p2424_p0 = pnand %p2423_p13, %p2609_p6 }
  0x35   : > { %2311 = vmatprep.subr.bf16.mxu1 %v2407_v20  ;;  %s2428_s3 = scalar_lea.vmem %s2427_s2, 16384  ;;  %p2429_p2 = scmp.lt.s32.totalorder %s3194_s22, %s2427_s2 }
  0x36   : > { %p2425_p1 = pneg %p2424_p0  ;;  %p2430_p3 = scmp.lt.s32.totalorder %s2428_s3, %s2422_s1 }
  0x37   : > { %2297 = vmatmul.mubr.msk.f32.gmra.mrb[2].mxu0 %vm565_vm1, %v559_v12 }
  0x38   : > { %2299 = vmatprep.mubr.msk.f32.mxu0 %vm565_vm1, %v560_v13  ;;  %2312 = vmatpush3.bf16.msra.mxu1 %v2407_v20  ;;  %p2431_p4 = por %p2430_p3, %p2429_p2 }
  0x3a   : > { %p2432_p5 = pnand %p2431_p4, %p2425_p1 }
  0x3b   : > { %2300 = vmatmul.mubr.msk.f32.gmra.mrb[4].mxu0 %vm565_vm1, %v561_v14 }
  0x3c   : > { %2302 = vmatprep.mubr.msk.f32.mxu0 %vm565_vm1, %v562_v15 }
  0x3f   : > { %2303 = vmatmul.mubr.msk.f32.gmra.mrb[6].mxu0 %vm565_vm1, %v563_v16 }
 0x106   : > { %v2295_v22 = vpop.f32.mrb[0].mxu0 }
 0x107   : > { %v2657_v23 = vadd.f32 %v2295_v22, %v2167_v21  ;;  %v660_v24 = vpop.f32.mrb[1].mxu0 }
 0x108   : > { %v2659_v25 = vadd.f32 %v2167_v21, %v660_v24 }
 0x109   : > { %v716_v26 = vsel %vm714_vm2, %v2657_v23, 0.0  ;;  %v733_v27 = vmul.f32 %v2657_v23, %v2657_v23 }
 0x10a   : > { %v715_v28 = vsel %vm714_vm2, %v2659_v25, 0.0  ;;  %v732_v29 = vmul.f32 %v2659_v25, %v2659_v25  ;;  %v2298_v30 = vpop.f32.mrb[2].mxu0 }
 0x10b   : > { %v741_v31 = vsel %vm714_vm2, %v733_v27, 0.0  ;;  %v717_v32 = vadd.f32 %v716_v26, %v715_v28  ;;  %v709_v33 = vadd.f32 %v2298_v30, %v2167_v21  ;;  %v670_v34 = vpop.f32.mrb[3].mxu0 }
 0x10c   : > { %v740_v35 = vsel %vm714_vm2, %v732_v29, 0.0  ;;  %v708_v36 = vadd.f32 %v2167_v21, %v670_v34 }
 0x10d   : > { %v742_v37 = vadd.f32 %v741_v31, %v740_v35  ;;  %v735_v38 = vmul.f32 %v709_v33, %v709_v33  ;;  %v720_v45 = vsel %vm714_vm2, %v709_v33, 0.0 }
 0x10e   : > { %v718_v39 = vsel %vm714_vm2, %v708_v36, 0.0  ;;  %v734_v40 = vmul.f32 %v708_v36, %v708_v36  ;;  %v2301_v41 = vpop.f32.mrb[4].mxu0 }
 0x10f   : > { %v719_v42 = vadd.f32 %v718_v39, %v717_v32  ;;  %v711_v43 = vadd.f32 %v2301_v41, %v2167_v21  ;;  %v680_v44 = vpop.f32.mrb[5].mxu0  ;;  %v745_v50 = vsel %vm714_vm2, %v735_v38, 0.0 }
 0x110   : > { %v743_v46 = vsel %vm714_vm2, %v734_v40, 0.0  ;;  %v710_v47 = vadd.f32 %v2167_v21, %v680_v44 }
 0x111   : > { %v744_v48 = vadd.f32 %v743_v46, %v742_v37  ;;  %v721_v49 = vadd.f32 %v720_v45, %v719_v42  ;;  %v737_v51 = vmul.f32 %v711_v43, %v711_v43  ;;  %v724_v59 = vsel %vm714_vm2, %v711_v43, 0.0 }
 0x112   : > { %v722_v52 = vsel %vm714_vm2, %v710_v47, 0.0  ;;  %v736_v53 = vmul.f32 %v710_v47, %v710_v47  ;;  %v2304_v54 = vpop.f32.mrb[6].mxu0 }
 0x113   : > { %v723_v55 = vadd.f32 %v722_v52, %v721_v49  ;;  %v746_v56 = vadd.f32 %v745_v50, %v744_v48  ;;  %v713_v57 = vadd.f32 %v2304_v54, %v2167_v21  ;;  %v690_v58 = vpop.f32.mrb[7].mxu0  ;;  %v749_v0 = vsel %vm714_vm2, %v737_v51, 0.0  ;;  %v2408_v52 = vld [vmem:[%s3251_s9] sm:$0xff]   ;;  %v2410_v54 = vld [vmem:[%s3251_s9 + $0x10] sm:$0xff]  }
 0x114   : > { %v747_v60 = vsel %vm714_vm2, %v736_v53, 0.0  ;;  %v712_v61 = vadd.f32 %v2167_v21, %v690_v58  ;;  %v2169_v21 = vld [vmem:[%s3270_s4] ss:$0 sm:$0xff]  ;;  %2321 = vmatprep.subr.bf16.mxu0 %v2408_v52  ;;  %v2409_v53 = vld [vmem:[%s3251_s9 + $0x8] sm:$0xff]   ;;  %v2414_v58 = vld [vmem:[%s3251_s9 + $0x30] sm:$0xff]  }
 0x115   : > { %v748_v62 = vadd.f32 %v747_v60, %v746_v56  ;;  %v725_v63 = vadd.f32 %v724_v59, %v723_v55  ;;  %v739_v1 = vmul.f32 %v713_v57, %v713_v57  ;;  %v728_v6 = vsel %vm714_vm2, %v713_v57, 0.0  ;;  %2322 = vmatpush3.bf16.msra.mxu0 %v2408_v52  ;;  %v2411_v55 = vld [vmem:[%s3251_s9 + $0x18] sm:$0xff]   ;;  %v2412_v56 = vld [vmem:[%s3251_s9 + $0x20] sm:$0xff]  }
 0x116   : > { %v726_v2 = vsel %vm714_vm2, %v712_v61, 0.0  ;;  %v738_v3 = vmul.f32 %v712_v61, %v712_v61  ;;  %2323 = vmatprep.subr.bf16.mxu0 %v2409_v53  ;;  %v2415_v59 = vld [vmem:[%s3251_s9 + $0x38] sm:$0xff]   ;;  %v2178_v60 = vld [vmem:[%s3248_s6] ss:$0 sm:$0xff] }
 0x117   : > { %v727_v4 = vadd.f32 %v726_v2, %v725_v63  ;;  %v750_v5 = vadd.f32 %v749_v0, %v748_v62  ;;  %v753_v10 = vsel %vm714_vm2, %v739_v1, 0.0 }
 0x118   : > { %v751_v7 = vsel %vm714_vm2, %v738_v3, 0.0 }
 0x119   : > { %v729_v8 = vadd.f32 %v728_v6, %v727_v4  ;;  %v752_v9 = vadd.f32 %v751_v7, %v750_v5  ;;  %2324 = vmatpush3.bf16.msra.mxu0 %v2409_v53 }
 0x11a   : > { %2325 = vmatprep.subr.bf16.mxu0 %v2410_v54 }
 0x11b   : > { %v731_v11 = vmul.f32 0.125, %v729_v8  ;;  %v754_v12 = vadd.f32 %v753_v10, %v752_v9 }
 0x11d   : > { %v755_v13 = vmul.f32 0.125, %v754_v12  ;;  %v756_v14 = vmul.f32 %v731_v11, %v731_v11  ;;  %2326 = vmatpush3.bf16.msra.mxu0 %v2410_v54 }
 0x11e   : > { %2327 = vmatprep.subr.bf16.mxu0 %v2411_v55 }
 0x11f   : > { %v757_v15 = vsub.f32 %v755_v13, %v756_v14 }
 0x121   : > { %v758_v16 = vmax.f32 %v757_v15, 0.0  ;;  %2328 = vmatpush3.bf16.msra.mxu0 %v2411_v55 }
 0x122   : > { %2329 = vmatprep.subr.bf16.mxu0 %v2412_v56 }
 0x123   : > { %v760_v17 = vadd.f32 1e-05, %v758_v16 }
 0x125   : > { %2416 = vrsqrt.f32 %v760_v17  ;;  %2330 = vmatpush3.bf16.msra.mxu0 %v2412_v56 }
 0x12f   : > { %v2417_v19 = vpop.eup %2416 }
 0x130   : > { %v768_v20 = vmul.f32 %v2417_v19, %v2168_v18 }
 0x132   : > { %v770_v22 = vmul.f32 %v768_v20, %v731_v11  ;;  %v784_v24 = vmul.f32 %v768_v20, %v712_v61  ;;  %v778_v26 = vmul.f32 %v768_v20, %v2659_v25  ;;  %v779_v27 = vmul.f32 %v768_v20, %v2657_v23 }
 0x133   : > { %v780_v28 = vmul.f32 %v768_v20, %v708_v36  ;;  %v781_v29 = vmul.f32 %v768_v20, %v709_v33  ;;  %v782_v30 = vmul.f32 %v768_v20, %v710_v47  ;;  %v783_v31 = vmul.f32 %v768_v20, %v711_v43 }
 0x134   : > { %v777_v32 = vsub.f32 %v2169_v21, %v770_v22  ;;  %v785_v34 = vmul.f32 %v768_v20, %v713_v57  ;;  %v2413_v57 = vld [vmem:[%s3251_s9 + $0x28] sm:$0xff]  }
 0x135   : > { %2331 = vmatprep.subr.bf16.mxu0 %v2413_v57 }
 0x136   : > { %v792_v35 = vadd.f32 %v784_v24, %v777_v32  ;;  %v786_v37 = vadd.f32 %v778_v26, %v777_v32  ;;  %v787_v38 = vadd.f32 %v779_v27, %v777_v32  ;;  %v788_v39 = vadd.f32 %v780_v28, %v777_v32  ;;  %2332 = vmatpush3.bf16.msra.mxu0 %v2413_v57 }
 0x137   : > { %v789_v40 = vadd.f32 %v781_v29, %v777_v32  ;;  %v790_v41 = vadd.f32 %v782_v30, %v777_v32  ;;  %v791_v42 = vadd.f32 %v783_v31, %v777_v32  ;;  %v793_v44 = vadd.f32 %v785_v34, %v777_v32  ;;  %2333 = vmatprep.subr.bf16.mxu0 %v2414_v58 }
 0x138   : > { %v800_v45 = vmax.f32 %v792_v35, 0.0  ;;  %v794_v46 = vmax.f32 %v786_v37, 0.0  ;;  %v795_v48 = vmax.f32 %v787_v38, 0.0  ;;  %v796_v25 = vmax.f32 %v788_v39, 0.0 }
 0x139   : > { %v797_v49 = vmax.f32 %v789_v40, 0.0  ;;  %v798_v23 = vmax.f32 %v790_v41, 0.0  ;;  %v799_v36 = vmax.f32 %v791_v42, 0.0  ;;  %v801_v33 = vmax.f32 %v793_v44, 0.0 }
 0x13a   : > { %v802_v47 = vpack.c.bf16 %v795_v48, %v794_v46  ;;  %2334 = vmatpush3.bf16.msra.mxu0 %v2414_v58  ;;  %v2179_v46 = vld [vmem:[%s3249_s7] ss:$0 sm:$0xff] }
 0x13b   : > { %v803_v43 = vpack.c.bf16 %v797_v49, %v796_v25  ;;  %v804_v50 = vpack.c.bf16 %v799_v36, %v798_v23  ;;  %v805_v51 = vpack.c.bf16 %v801_v33, %v800_v45  ;;  %2335 = vmatprep.subr.bf16.mxu0 %v2415_v59  ;;  %v2180_v49 = vld [vmem:[%s3250_s8] ss:$0 sm:$0xff] }
 0x13c   : > { %2313 = vmatprep.mubr.msk.bf16.mxu1 %vm714_vm2, %v802_v47 }
 0x13d   : > { %2314 = vmatmul.mubr.msk.bf16.vlgmr.msra.gmra.mrb[0].mxu1 %vm714_vm2, %v803_v43 }
 0x13e   : > { %2317 = vmatprep.mubr.msk.bf16.mxu1 %vm714_vm2, %v804_v50  ;;  %2336 = vmatpush3.bf16.msra.mxu0 %v2415_v59 }
 0x145   : > { %2318 = vmatmul.mubr.msk.bf16.gmra.mrb[4].mxu1 %vm714_vm2, %v805_v51 }
 0x210   : > { %v2315_v61 = vpop.f32.mrb[0].mxu1 }
 0x211   : > { %v884_v62 = vpop.f32.mrb[1].mxu1  ;;  %v924_v2 = vadd.f32 %v2315_v61, %v2178_v60 }
 0x212   : > { %v922_v63 = vadd.f32 %v2178_v60, %v884_v62  ;;  %v2316_v0 = vpop.f32.mrb[2].mxu1 }
 0x213   : > { %v887_v1 = vpop.f32.mrb[3].mxu1  ;;  %v925_v5 = vadd.f32 %v2316_v0, %v2178_v60  ;;  %v940_v8 = vmul.f32 %v924_v2, %v924_v2 }
 0x214   : > { %v923_v3 = vadd.f32 %v2178_v60, %v887_v1  ;;  %v938_v4 = vmul.f32 %v922_v63, %v922_v63 }
 0x215   : > { %v941_v13 = vmul.f32 %v925_v5, %v925_v5 }
 0x216   : > { %v930_v6 = vadd.f32 %v923_v3, %v922_v63  ;;  %v939_v7 = vmul.f32 %v923_v3, %v923_v3 }
 0x218   : > { %v931_v9 = vadd.f32 %v930_v6, %v924_v2  ;;  %v946_v10 = vadd.f32 %v939_v7, %v938_v4  ;;  %v2319_v11 = vpop.f32.mrb[4].mxu1 }
 0x219   : > { %v900_v12 = vpop.f32.mrb[5].mxu1  ;;  %v928_v18 = vadd.f32 %v2319_v11, %v2178_v60  ;;  %v1222_v11 = vld [vmem:[%s3255_s13] sm:$0xff] }
 0x21a   : > { %v947_v14 = vadd.f32 %v946_v10, %v940_v8  ;;  %v926_v15 = vadd.f32 %v2178_v60, %v900_v12  ;;  %v932_v16 = vadd.f32 %v931_v9, %v925_v5  ;;  %v2320_v17 = vpop.f32.mrb[6].mxu1  ;;  %v1226_v12 = vld [vmem:[%s3255_s13 + $0x20] sm:$0xff] }
 0x21b   : > { %v903_v19 = vpop.f32.mrb[7].mxu1  ;;  %v929_v27 = vadd.f32 %v2320_v17, %v2178_v60  ;;  %v944_v30 = vmul.f32 %v928_v18, %v928_v18 }
 0x21c   : > { %v933_v20 = vadd.f32 %v932_v16, %v926_v15  ;;  %v942_v21 = vmul.f32 %v926_v15, %v926_v15  ;;  %v948_v22 = vadd.f32 %v947_v14, %v941_v13  ;;  %v927_v24 = vadd.f32 %v2178_v60, %v903_v19  ;;  %v1223_v13 = vld [vmem:[%s3255_s13 + $0x8] sm:$0xff]  ;;  %v1230_v19 = vld [vmem:[%s3255_s13 + $0x40] sm:$0xff] }
 0x21d   : > { %v945_v34 = vmul.f32 %v929_v27, %v929_v27  ;;  %v2193_v14 = vcombine.high %v1222_v11, %v1226_v12  ;;  %v2192_v16 = vcombine.low %v1222_v11, %v1226_v12 }
 0x21e   : > { %v949_v26 = vadd.f32 %v948_v22, %v942_v21  ;;  %v934_v28 = vadd.f32 %v933_v20, %v927_v24  ;;  %v943_v29 = vmul.f32 %v927_v24, %v927_v24  ;;  %v1234_v20 = vld [vmem:[%s3255_s13 + $0x60] sm:$0xff]  ;;  %v1231_v21 = vld [vmem:[%s3255_s13 + $0x48] sm:$0xff] }
 0x21f   : > { %1606 = vmatprep.subr.bf16.mxu1 %v2193_v14  ;;  %v2201_v22 = vcombine.high %v1230_v19, %v1234_v20 }
 0x220   : > { %v935_v31 = vadd.f32 %v934_v28, %v928_v18  ;;  %v950_v32 = vadd.f32 %v949_v26, %v943_v29  ;;  %1607 = vmatpush1.bf16.msra.mxu1 %v2192_v16  ;;  %v2200_v26 = vcombine.low %v1230_v19, %v1234_v20  ;;  %v1238_v29 = vld [vmem:[%s3255_s13 + $0x80] sm:$0xff]  ;;  %v1225_v16 = vld [vmem:[%s3255_s13 + $0x18] sm:$0xff] }
 0x221   : > { %1608 = vmatprep.subr.bf16.mxu1 %v2201_v22  ;;  %v2189_v20 = vld [vmem:[%s3252_s10] ss:$0 sm:$0xff] }
 0x222   : > { %v936_v35 = vadd.f32 %v935_v31, %v929_v27  ;;  %v951_v37 = vadd.f32 %v950_v32, %v944_v30  ;;  %v1242_v30 = vld [vmem:[%s3255_s13 + $0xa0] sm:$0xff]  ;;  %v1239_v31 = vld [vmem:[%s3255_s13 + $0x88] sm:$0xff] }
 0x223   : > { %v2209_v32 = vcombine.high %v1238_v29, %v1242_v30 }
 0x224   : > { %v937_v38 = vmul.f32 0.125, %v936_v35  ;;  %v952_v39 = vadd.f32 %v951_v37, %v945_v34  ;;  %1609 = vmatpush1.bf16.msra.mxu1 %v2200_v26  ;;  %v1243_v34 = vld [vmem:[%s3255_s13 + $0xa8] sm:$0xff]  ;;  %v2208_v35 = vcombine.low %v1238_v29, %v1242_v30 }
 0x225   : > { %v2210_v37 = vcombine.low %v1239_v31, %v1243_v34  ;;  %1610 = vmatprep.subr.bf16.mxu1 %v2209_v32 }
 0x226   : > { %v953_v40 = vmul.f32 0.125, %v952_v39  ;;  %v954_v41 = vmul.f32 %v937_v38, %v937_v38  ;;  %v1246_v39 = vld [vmem:[%s3255_s13 + $0xc0] sm:$0xff] }
 0x228   : > { %v955_v42 = vsub.f32 %v953_v40, %v954_v41  ;;  %1611 = vmatpush1.bf16.msra.mxu1 %v2208_v35  ;;  %v1250_v40 = vld [vmem:[%s3255_s13 + $0xe0] sm:$0xff]  ;;  %v1247_v41 = vld [vmem:[%s3255_s13 + $0xc8] sm:$0xff] }
 0x22a   : > { %v956_v44 = vmax.f32 %v955_v42, 0.0  ;;  %v2217_v42 = vcombine.high %v1246_v39, %v1250_v40 }
 0x22c   : > { %v958_v45 = vadd.f32 1e-05, %v956_v44  ;;  %v1251_v44 = vld [vmem:[%s3255_s13 + $0xe8] sm:$0xff]  ;;  %1612 = vmatprep.subr.bf16.mxu1 %v2217_v42 }
 0x22e   : > { %2418 = vrsqrt.f32 %v958_v45  ;;  %v2216_v45 = vcombine.low %v1246_v39, %v1250_v40 }
 0x230   : > { %1613 = vmatpush1.bf16.msra.mxu1 %v2216_v45 }
 0x238   : > { %v2419_v48 = vpop.eup %2418 }
 0x239   : > { %v966_v25 = vmul.f32 %v2419_v48, %v2179_v46  ;;  %v2218_v46 = vcombine.low %v1247_v41, %v1251_v44  ;;  %v2219_v48 = vcombine.high %v1247_v41, %v1251_v44 }
 0x23b   : > { %v968_v23 = vmul.f32 %v966_v25, %v937_v38  ;;  %v981_v36 = vmul.f32 %v966_v25, %v927_v24  ;;  %v976_v33 = vmul.f32 %v966_v25, %v922_v63  ;;  %v977_v47 = vmul.f32 %v966_v25, %v923_v3  ;;  %v1235_v24 = vld [vmem:[%s3255_s13 + $0x68] sm:$0xff] }
 0x23c   : > { %v978_v43 = vmul.f32 %v966_v25, %v924_v2  ;;  %v979_v50 = vmul.f32 %v966_v25, %v925_v5  ;;  %v980_v51 = vmul.f32 %v966_v25, %v926_v15  ;;  %v982_v52 = vmul.f32 %v966_v25, %v928_v18  ;;  %v1227_v15 = vld [vmem:[%s3255_s13 + $0x28] sm:$0xff] }
 0x23d   : > { %v975_v53 = vsub.f32 %v2180_v49, %v968_v23  ;;  %v983_v54 = vmul.f32 %v966_v25, %v929_v27  ;;  %v2194_v17 = vcombine.low %v1223_v13, %v1227_v15  ;;  %v2195_v18 = vcombine.high %v1223_v13, %v1227_v15  ;;  %v1254_v25 = vld [vmem:[%s3255_s13 + $0x100] sm:$0xff]  ;;  %v1255_v23 = vld [vmem:[%s3255_s13 + $0x108] sm:$0xff] }
 0x23e   : > { %v2202_v27 = vcombine.low %v1231_v21, %v1235_v24  ;;  %v2203_v28 = vcombine.high %v1231_v21, %v1235_v24  ;;  %v2211_v38 = vcombine.high %v1239_v31, %v1243_v34  ;;  %v1258_v49 = vld [vmem:[%s3255_s13 + $0x120] sm:$0xff]  ;;  %v2486_v13 = vmov 0  }
 0x23f   : > { %v984_v55 = vadd.f32 %v976_v33, %v975_v53  ;;  %v985_v56 = vadd.f32 %v977_v47, %v975_v53  ;;  %v986_v57 = vadd.f32 %v978_v43, %v975_v53  ;;  %v987_v58 = vadd.f32 %v979_v50, %v975_v53  ;;  %1679 = vmatprep.subr.bf16.mxu0 %v2195_v18  ;;  %v1259_v33 = vld [vmem:[%s3255_s13 + $0x128] sm:$0xff] }
 0x240   : > { %v988_v59 = vadd.f32 %v980_v51, %v975_v53  ;;  %v989_v60 = vadd.f32 %v981_v36, %v975_v53  ;;  %v990_v61 = vadd.f32 %v982_v52, %v975_v53  ;;  %v991_v62 = vadd.f32 %v983_v54, %v975_v53  ;;  %v1262_v51 = vld [vmem:[%s3255_s13 + $0x140] sm:$0xff]  ;;  %v1263_v53 = vld [vmem:[%s3255_s13 + $0x148] sm:$0xff]  ;;  %1638 = vmatprep.mubr.bf16.mxu1 %v2486_v13 }
 0x241   : > { %v992_v0 = vmax.f32 %v984_v55, 0.0  ;;  %v993_v1 = vmax.f32 %v985_v56, 0.0  ;;  %v994_v4 = vmax.f32 %v986_v57, 0.0  ;;  %v995_v6 = vmax.f32 %v987_v58, 0.0  ;;  %v1266_v52 = vld [vmem:[%s3255_s13 + $0x160] sm:$0xff]  ;;  %v1267_v55 = vld [vmem:[%s3255_s13 + $0x168] sm:$0xff] }
 0x242   : > { %v996_v63 = vmax.f32 %v988_v59, 0.0  ;;  %v997_v3 = vmax.f32 %v989_v60, 0.0  ;;  %v998_v2 = vmax.f32 %v990_v61, 0.0  ;;  %v999_v5 = vmax.f32 %v991_v62, 0.0  ;;  %v1270_v59 = vld [vmem:[%s3255_s13 + $0x180] sm:$0xff]  ;;  %v1271_v61 = vld [vmem:[%s3255_s13 + $0x188] sm:$0xff] }
 0x243   : > { %v1000_v7 = vpack.c.bf16 %v993_v1, %v992_v0  ;;  %v1001_v8 = vpack.c.bf16 %v995_v6, %v994_v4  ;;  %v2225_v36 = vcombine.high %v1254_v25, %v1258_v49  ;;  %v2224_v47 = vcombine.low %v1254_v25, %v1258_v49  ;;  %v1274_v60 = vld [vmem:[%s3255_s13 + $0x1a0] sm:$0xff]  ;;  %v1275_v0 = vld [vmem:[%s3255_s13 + $0x1a8] sm:$0xff] }
 0x244   : > { %v1002_v9 = vpack.c.bf16 %v997_v3, %v996_v63  ;;  %v1003_v10 = vpack.c.bf16 %v999_v5, %v998_v2  ;;  %v2226_v43 = vcombine.low %v1255_v23, %v1259_v33  ;;  %v2227_v50 = vcombine.high %v1255_v23, %v1259_v33  ;;  %v1278_v63 = vld [vmem:[%s3255_s13 + $0x1c0] sm:$0xff]  ;;  %v1279_v2 = vld [vmem:[%s3255_s13 + $0x1c8] sm:$0xff] }
 0x245   : > { %2337 = vmatprep.mubr.bf16.mxu0 %v1000_v7  ;;  %1614 = vmatprep.subr.bf16.mxu1 %v2225_v36  ;;  %v2233_v54 = vcombine.high %v1262_v51, %v1266_v52  ;;  %v2232_v56 = vcombine.low %v1262_v51, %v1266_v52  ;;  %v2234_v57 = vcombine.low %v1263_v53, %v1267_v55  ;;  %v1282_v3 = vld [vmem:[%s3255_s13 + $0x1e0] sm:$0xff] }
 0x246   : > { %2338 = vmatmul.mubr.bf16.vlgmr.msra.gmra.mrb[8].mxu0 %v1001_v8  ;;  %1615 = vmatpush1.bf16.msra.mxu1 %v2224_v47  ;;  %v2235_v58 = vcombine.high %v1263_v53, %v1267_v55  ;;  %v2241_v62 = vcombine.high %v1270_v59, %v1274_v60  ;;  %v2240_v1 = vcombine.low %v1270_v59, %v1274_v60  ;;  %v1283_v8 = vld [vmem:[%s3255_s13 + $0x1e8] sm:$0xff] }
 0x247   : > { %2341 = vmatprep.mubr.bf16.mxu0 %v1002_v9  ;;  %1680 = vmatpush1.bf16.msra.mxu0 %v2194_v17  ;;  %v2242_v4 = vcombine.low %v1271_v61, %v1275_v0  ;;  %v2243_v6 = vcombine.high %v1271_v61, %v1275_v0  ;;  %v2248_v5 = vcombine.low %v1278_v63, %v1282_v3  ;;  %v2827_v9 = vld [vmem:[%s3255_s13 + $0x10] sm:$0xff]  ;;  %v1229_v17 = vld [vmem:[%s3255_s13 + $0x38] sm:$0xff] }
 0x248   : > { %1681 = vmatprep.subr.bf16.mxu0 %v2203_v28  ;;  %1616 = vmatprep.subr.bf16.mxu1 %v2233_v54  ;;  %v2249_v7 = vcombine.high %v1278_v63, %v1282_v3  ;;  %v2250_v11 = vcombine.low %v1279_v2, %v1283_v8  ;;  %v2251_v12 = vcombine.high %v1279_v2, %v1283_v8  ;;  %v2191_v3 = vld [vmem:[%s3254_s12] ss:$0 sm:$0xff] }
 0x249   : > { %v2846_v18 = vcombine.high %v1225_v16, %v1229_v17  ;;  %v2848_v19 = vcombine.low %v1225_v16, %v1229_v17 }
 0x24a   : > { %1617 = vmatpush1.bf16.msra.mxu1 %v2232_v56 }
 0x24b   : > { %1682 = vmatpush1.bf16.msra.mxu0 %v2202_v27  ;;  %1618 = vmatprep.subr.bf16.mxu1 %v2241_v62 }
 0x24c   : > { %1683 = vmatprep.subr.bf16.mxu0 %v2211_v38 }
 0x24e   : > { %2342 = vmatmul.mubr.bf16.gmra.mrb[12].mxu0 %v1003_v10  ;;  %1619 = vmatpush1.bf16.msra.mxu1 %v2240_v1  ;;  %v2832_v10 = vld [vmem:[%s3255_s13 + $0x30] sm:$0xff] }
 0x24f   : > { %1684 = vmatpush1.bf16.msra.mxu0 %v2210_v37  ;;  %1711 = vmatprep.mubr.bf16.mxu0 %v2486_v13  ;;  %v2196_v14 = vcombine.low %v2827_v9, %v2832_v10  ;;  %v2197_v15 = vcombine.high %v2827_v9, %v2832_v10  ;;  %v1252_v9 = vld [vmem:[%s3255_s13 + $0xf0] sm:$0xff]  ;;  %v1249_v10 = vld [vmem:[%s3255_s13 + $0xd8] sm:$0xff] }
 0x250   : > { %1685 = vmatprep.subr.bf16.mxu0 %v2219_v48  ;;  %1620 = vmatprep.subr.bf16.mxu1 %v2249_v7 }
 0x252   : > { %1621 = vmatpush1.bf16.msra.mxu1 %v2248_v5 }
 0x253   : > { %1686 = vmatpush1.bf16.msra.mxu0 %v2218_v46  ;;  %1752 = vmatprep.subr.bf16.mxu1 %v2197_v15 }
 0x254   : > { %1687 = vmatprep.subr.bf16.mxu0 %v2227_v50 }
 0x257   : > { %1688 = vmatpush1.bf16.msra.mxu0 %v2226_v43 }
 0x258   : > { %1689 = vmatprep.subr.bf16.mxu0 %v2235_v58 }
 0x25b   : > { %1690 = vmatpush1.bf16.msra.mxu0 %v2234_v57 }
 0x25c   : > { %1691 = vmatprep.subr.bf16.mxu0 %v2243_v6 }
 0x25f   : > { %1692 = vmatpush1.bf16.msra.mxu0 %v2242_v4  ;;  %v2190_v4 = vld [vmem:[%s3253_s11] ss:$0 sm:$0xff] }
 0x260   : > { %1693 = vmatprep.subr.bf16.mxu0 %v2251_v12 }
 0x263   : > { %1694 = vmatpush1.bf16.msra.mxu0 %v2250_v11 }
 0x264   : > { %1825 = vmatprep.subr.bf16.mxu0 %v2846_v18 }
 0x319   : > { %v2339_v21 = vpop.f32.mrb[8].mxu0 }
 0x31a   : > { %v1102_v22 = vpop.f32.mrb[9].mxu0  ;;  %v1142_v28 = vadd.f32 %v2339_v21, %v2189_v20 }
 0x31b   : > { %v1140_v24 = vadd.f32 %v2189_v20, %v1102_v22  ;;  %v2340_v26 = vpop.f32.mrb[10].mxu0 }
 0x31c   : > { %v1105_v27 = vpop.f32.mrb[11].mxu0  ;;  %v1143_v31 = vadd.f32 %v2340_v26, %v2189_v20  ;;  %v1158_v35 = vmul.f32 %v1142_v28, %v1142_v28 }
 0x31d   : > { %v1141_v29 = vadd.f32 %v2189_v20, %v1105_v27  ;;  %v1156_v30 = vmul.f32 %v1140_v24, %v1140_v24  ;;  %v1232_v27 = vld [vmem:[%s3255_s13 + $0x50] sm:$0xff] }
 0x31e   : > { %v1159_v41 = vmul.f32 %v1143_v31, %v1143_v31 }
 0x31f   : > { %v1148_v32 = vadd.f32 %v1141_v29, %v1140_v24  ;;  %v1157_v34 = vmul.f32 %v1141_v29, %v1141_v29 }
 0x321   : > { %v1149_v37 = vadd.f32 %v1148_v32, %v1142_v28  ;;  %v1164_v38 = vadd.f32 %v1157_v34, %v1156_v30  ;;  %v2343_v39 = vpop.f32.mrb[12].mxu0  ;;  %v1236_v32 = vld [vmem:[%s3255_s13 + $0x70] sm:$0xff] }
 0x322   : > { %v1118_v40 = vpop.f32.mrb[13].mxu0  ;;  %v1146_v48 = vadd.f32 %v2343_v39, %v2189_v20 }
 0x323   : > { %v1165_v42 = vadd.f32 %v1164_v38, %v1158_v35  ;;  %v1144_v44 = vadd.f32 %v2189_v20, %v1118_v40  ;;  %v1150_v45 = vadd.f32 %v1149_v37, %v1143_v31  ;;  %v2344_v46 = vpop.f32.mrb[14].mxu0 }
 0x324   : > { %v1121_v25 = vpop.f32.mrb[15].mxu0  ;;  %v1147_v43 = vadd.f32 %v2344_v46, %v2189_v20  ;;  %v1162_v52 = vmul.f32 %v1146_v48, %v1146_v48 }
 0x325   : > { %v1151_v49 = vadd.f32 %v1150_v45, %v1144_v44  ;;  %v1160_v23 = vmul.f32 %v1144_v44, %v1144_v44  ;;  %v1166_v36 = vadd.f32 %v1165_v42, %v1159_v41  ;;  %v1145_v33 = vadd.f32 %v2189_v20, %v1121_v25 }
 0x326   : > { %v1163_v55 = vmul.f32 %v1147_v43, %v1147_v43 }
 0x327   : > { %v1167_v47 = vadd.f32 %v1166_v36, %v1160_v23  ;;  %v1152_v50 = vadd.f32 %v1151_v49, %v1145_v33  ;;  %v1161_v51 = vmul.f32 %v1145_v33, %v1145_v33  ;;  %v1240_v49 = vld [vmem:[%s3255_s13 + $0x90] sm:$0xff] }
 0x328   : > { %v1244_v23 = vld [vmem:[%s3255_s13 + $0xb0] sm:$0xff] }
 0x329   : > { %v1153_v53 = vadd.f32 %v1152_v50, %v1146_v48  ;;  %v1168_v54 = vadd.f32 %v1167_v47, %v1161_v51  ;;  %v1245_v47 = vld [vmem:[%s3255_s13 + $0xb8] sm:$0xff]  ;;  %v2204_v51 = vcombine.low %v1232_v27, %v1236_v32 }
 0x32b   : > { %v1154_v56 = vadd.f32 %v1153_v53, %v1147_v43  ;;  %v1169_v57 = vadd.f32 %v1168_v54, %v1162_v52  ;;  %v2213_v53 = vcombine.high %v1240_v49, %v1244_v23 }
 0x32d   : > { %v1155_v58 = vmul.f32 0.125, %v1154_v56  ;;  %v1170_v59 = vadd.f32 %v1169_v57, %v1163_v55  ;;  %v1248_v55 = vld [vmem:[%s3255_s13 + $0xd0] sm:$0xff]  ;;  %v2212_v56 = vcombine.low %v1240_v49, %v1244_v23 }
 0x32f   : > { %v1171_v60 = vmul.f32 0.125, %v1170_v59  ;;  %v1172_v61 = vmul.f32 %v1155_v58, %v1155_v58 }
 0x331   : > { %v1173_v62 = vsub.f32 %v1171_v60, %v1172_v61  ;;  %v1256_v60 = vld [vmem:[%s3255_s13 + $0x110] sm:$0xff] }
 0x332   : > { %v1260_v61 = vld [vmem:[%s3255_s13 + $0x130] sm:$0xff] }
 0x333   : > { %v1174_v0 = vmax.f32 %v1173_v62, 0.0  ;;  %v1257_v62 = vld [vmem:[%s3255_s13 + $0x118] sm:$0xff] }
 0x335   : > { %v1176_v1 = vadd.f32 1e-05, %v1174_v0  ;;  %v1261_v0 = vld [vmem:[%s3255_s13 + $0x138] sm:$0xff] }
 0x337   : > { %2420 = vrsqrt.f32 %v1176_v1  ;;  %v2220_v1 = vcombine.low %v1248_v55, %v1252_v9 }
 0x341   : > { %v2421_v6 = vpop.eup %2420 }
 0x342   : > { %v1184_v63 = vmul.f32 %v2421_v6, %v2190_v4  ;;  %v2229_v6 = vcombine.high %v1256_v60, %v1260_v61 }
 0x344   : > { %v1186_v2 = vmul.f32 %v1184_v63, %v1155_v58  ;;  %v1199_v5 = vmul.f32 %v1184_v63, %v1145_v33  ;;  %v1194_v7 = vmul.f32 %v1184_v63, %v1140_v24  ;;  %v1195_v8 = vmul.f32 %v1184_v63, %v1141_v29  ;;  %v1233_v24 = vld [vmem:[%s3255_s13 + $0x58] sm:$0xff] }
 0x345   : > { %v1196_v11 = vmul.f32 %v1184_v63, %v1142_v28  ;;  %v1197_v12 = vmul.f32 %v1184_v63, %v1143_v31  ;;  %v1198_v15 = vmul.f32 %v1184_v63, %v1144_v44  ;;  %v1200_v16 = vmul.f32 %v1184_v63, %v1146_v48  ;;  %v1237_v28 = vld [vmem:[%s3255_s13 + $0x78] sm:$0xff] }
 0x346   : > { %v1193_v17 = vsub.f32 %v2191_v3, %v1186_v2  ;;  %v1201_v20 = vmul.f32 %v1184_v63, %v1147_v43  ;;  %v2205_v48 = vcombine.high %v1232_v27, %v1236_v32  ;;  %v2874_v25 = vcombine.high %v1233_v24, %v1237_v28  ;;  %v1241_v33 = vld [vmem:[%s3255_s13 + $0x98] sm:$0xff]  ;;  %v1264_v3 = vld [vmem:[%s3255_s13 + $0x150] sm:$0xff] }
 0x347   : > { %v2900_v52 = vcombine.low %v1233_v24, %v1237_v28  ;;  %v2903_v54 = vcombine.high %v1241_v33, %v1245_v47  ;;  %v2920_v57 = vcombine.low %v1241_v33, %v1245_v47  ;;  %v2221_v58 = vcombine.high %v1248_v55, %v1252_v9  ;;  %v1268_v2 = vld [vmem:[%s3255_s13 + $0x170] sm:$0xff]  ;;  %v1281_v28 = vld [vmem:[%s3255_s13 + $0x1d8] sm:$0xff] }
 0x348   : > { %v1207_v21 = vadd.f32 %v1199_v5, %v1193_v17  ;;  %v1202_v22 = vadd.f32 %v1194_v7, %v1193_v17  ;;  %v1203_v26 = vadd.f32 %v1195_v8, %v1193_v17  ;;  %v1204_v30 = vadd.f32 %v1196_v11, %v1193_v17  ;;  %v1265_v5 = vld [vmem:[%s3255_s13 + $0x158] sm:$0xff]  ;;  %v1280_v32 = vld [vmem:[%s3255_s13 + $0x1d0] sm:$0xff] }
 0x349   : > { %v1205_v29 = vadd.f32 %v1197_v12, %v1193_v17  ;;  %v1206_v31 = vadd.f32 %v1198_v15, %v1193_v17  ;;  %v1208_v34 = vadd.f32 %v1200_v16, %v1193_v17  ;;  %v1209_v35 = vadd.f32 %v1201_v20, %v1193_v17  ;;  %v1269_v7 = vld [vmem:[%s3255_s13 + $0x178] sm:$0xff]  ;;  %v1272_v16 = vld [vmem:[%s3255_s13 + $0x190] sm:$0xff] }
 0x34a   : > { %v1215_v37 = vmax.f32 %v1207_v21, 0.0  ;;  %v1210_v38 = vmax.f32 %v1202_v22, 0.0  ;;  %v1211_v39 = vmax.f32 %v1203_v26, 0.0  ;;  %v1212_v40 = vmax.f32 %v1204_v30, 0.0  ;;  %v1276_v17 = vld [vmem:[%s3255_s13 + $0x1b0] sm:$0xff]  ;;  %v1273_v20 = vld [vmem:[%s3255_s13 + $0x198] sm:$0xff] }
 0x34b   : > { %v1213_v41 = vmax.f32 %v1205_v29, 0.0  ;;  %v1214_v42 = vmax.f32 %v1206_v31, 0.0  ;;  %v1216_v44 = vmax.f32 %v1208_v34, 0.0  ;;  %v1217_v45 = vmax.f32 %v1209_v35, 0.0  ;;  %v1277_v21 = vld [vmem:[%s3255_s13 + $0x1b8] sm:$0xff]  ;;  %v1284_v24 = vld [vmem:[%s3255_s13 + $0x1f0] sm:$0xff] }
 0x34c   : > { %v2872_v46 = vpack.c.bf16 %v1211_v39, %v1210_v38  ;;  %v2943_v63 = vcombine.high %v1257_v62, %v1261_v0  ;;  %v2228_v8 = vcombine.low %v1256_v60, %v1260_v61  ;;  %v2960_v11 = vcombine.low %v1257_v62, %v1261_v0  ;;  %v1285_v29 = vld [vmem:[%s3255_s13 + $0x1f8] sm:$0xff] }
 0x34d   : > { %v2882_v36 = vpack.c.bf16 %v1213_v41, %v1212_v40  ;;  %v2890_v43 = vpack.c.bf16 %v1215_v37, %v1214_v42  ;;  %v2892_v50 = vpack.c.bf16 %v1217_v45, %v1216_v44  ;;  %v2237_v12 = vcombine.high %v1264_v3, %v1268_v2  ;;  %v3027_v42 = vld [vmem:[%s3256_s14] sm:$0xff] }
 0x34e   : > { %1639 = vmatmul.mubr.bf16.vlgmr.msra.gmra.mrb[8].mxu1 %v2872_v46  ;;  %1712 = vmatmul.mubr.bf16.vlgmr.msra.gmra.mrb[16].mxu0 %v2872_v46  ;;  %v2239_v15 = vcombine.high %v1265_v5, %v1269_v7  ;;  %v2236_v22 = vcombine.low %v1264_v3, %v1268_v2  ;;  %v2238_v26 = vcombine.low %v1265_v5, %v1269_v7 }
 0x34f   : > { %1753 = vmatpush1.bf16.msra.mxu1 %v2196_v14  ;;  %1826 = vmatpush1.bf16.msra.mxu0 %v2848_v19  ;;  %v1253_v14 = vld [vmem:[%s3255_s13 + $0xf8] sm:$0xff]  ;;  %v2245_v27 = vcombine.high %v1272_v16, %v1276_v17  ;;  %v2247_v30 = vcombine.high %v1273_v20, %v1277_v21  ;;  %v2244_v31 = vcombine.low %v1272_v16, %v1276_v17 }
 0x350   : > { %1754 = vmatprep.subr.bf16.mxu1 %v2205_v48  ;;  %1827 = vmatprep.subr.bf16.mxu0 %v2874_v25  ;;  %v2923_v59 = vcombine.high %v1249_v10, %v1253_v14  ;;  %v2940_v4 = vcombine.low %v1249_v10, %v1253_v14  ;;  %v2246_v34 = vcombine.low %v1273_v20, %v1277_v21 }
 0x351   : > { %1648 = vmatprep.mubr.bf16.mxu1 %v2486_v13  ;;  %1721 = vmatprep.mubr.bf16.mxu0 %v2486_v13  ;;  %v2253_v35 = vcombine.high %v1280_v32, %v1284_v24  ;;  %v2255_v37 = vcombine.high %v1281_v28, %v1285_v29  ;;  %v2252_v38 = vcombine.low %v1280_v32, %v1284_v24 }
 0x352   : > { %v2254_v39 = vcombine.low %v1281_v28, %v1285_v29 }
 0x353   : > { %1755 = vmatpush1.bf16.msra.mxu1 %v2204_v51  ;;  %1828 = vmatpush1.bf16.msra.mxu0 %v2900_v52 }
 0x354   : > { %1756 = vmatprep.subr.bf16.mxu1 %v2213_v53  ;;  %1829 = vmatprep.subr.bf16.mxu0 %v2903_v54 }
 0x356   : > { %1649 = vmatmul.mubr.bf16.gmra.mrb[12].mxu1 %v2882_v36  ;;  %1722 = vmatmul.mubr.bf16.gmra.mrb[20].mxu0 %v2882_v36 }
 0x357   : > { %1757 = vmatpush1.bf16.msra.mxu1 %v2212_v56  ;;  %1830 = vmatpush1.bf16.msra.mxu0 %v2920_v57 }
 0x358   : > { %1758 = vmatprep.subr.bf16.mxu1 %v2221_v58  ;;  %1831 = vmatprep.subr.bf16.mxu0 %v2923_v59 }
 0x359   : > { %1658 = vmatprep.mubr.bf16.mxu1 %v2486_v13  ;;  %1731 = vmatprep.mubr.bf16.mxu0 %v2486_v13 }
 0x35b   : > { %1759 = vmatpush1.bf16.msra.mxu1 %v2220_v1  ;;  %1832 = vmatpush1.bf16.msra.mxu0 %v2940_v4 }
 0x35c   : > { %1760 = vmatprep.subr.bf16.mxu1 %v2229_v6  ;;  %1833 = vmatprep.subr.bf16.mxu0 %v2943_v63 }
 0x35e   : > { %1659 = vmatmul.mubr.bf16.gmra.mrb[16].mxu1 %v2890_v43  ;;  %1732 = vmatmul.mubr.bf16.gmra.mrb[24].mxu0 %v2890_v43 }
 0x35f   : > { %1761 = vmatpush1.bf16.msra.mxu1 %v2228_v8  ;;  %1834 = vmatpush1.bf16.msra.mxu0 %v2960_v11 }
 0x360   : > { %1762 = vmatprep.subr.bf16.mxu1 %v2237_v12  ;;  %1835 = vmatprep.subr.bf16.mxu0 %v2239_v15 }
 0x361   : > { %1668 = vmatprep.mubr.bf16.mxu1 %v2486_v13  ;;  %1741 = vmatprep.mubr.bf16.mxu0 %v2486_v13 }
 0x363   : > { %1763 = vmatpush1.bf16.msra.mxu1 %v2236_v22  ;;  %1836 = vmatpush1.bf16.msra.mxu0 %v2238_v26 }
 0x364   : > { %1764 = vmatprep.subr.bf16.mxu1 %v2245_v27  ;;  %1837 = vmatprep.subr.bf16.mxu0 %v2247_v30 }
 0x366   : > { %1669 = vmatmul.mubr.bf16.gmra.mrb[20].mxu1 %v2892_v50  ;;  %1742 = vmatmul.mubr.bf16.gmra.mrb[28].mxu0 %v2892_v50 }
 0x367   : > { %1765 = vmatpush1.bf16.msra.mxu1 %v2244_v31  ;;  %1838 = vmatpush1.bf16.msra.mxu0 %v2246_v34 }
 0x368   : > { %1766 = vmatprep.subr.bf16.mxu1 %v2253_v35  ;;  %1839 = vmatprep.subr.bf16.mxu0 %v2255_v37 }
 0x369   : > { %1784 = vmatprep.mubr.bf16.mxu1 %v2486_v13  ;;  %1857 = vmatprep.mubr.bf16.mxu0 %v2486_v13 }
 0x36b   : > { %1767 = vmatpush1.bf16.msra.mxu1 %v2252_v38  ;;  %1840 = vmatpush1.bf16.msra.mxu0 %v2254_v39 }
 0x36c   : > { %2345 = vmatprep.subr.bf16.mxu1 %v2846_v18  ;;  %v1900_v18 = vlaneseq }
 0x36e   : > { %1785 = vmatmul.mubr.bf16.vlgmr.msra.gmra.mrb[24].mxu1 %v2872_v46  ;;  %1858 = vmatmul.mubr.bf16.vlgmr.msra.gmra.mrb[32].mxu0 %v2872_v46 }
 0x36f   : > { %2353 = vmatpush1.bf16.msra.mxu1 %v2848_v19  ;;  %1794 = vmatprep.mubr.bf16.mxu1 %v2486_v13  ;;  %v3020_v19 = vshrl.u32 %v1900_v18, 7 }
 0x370   : > { %2346 = vmatprep.subr.bf16.mxu1 %v2874_v25  ;;  %1867 = vmatprep.mubr.bf16.mxu0 %v2486_v13 }
 0x371   : > { %v1902_v40 = vsub.s32 0, %v3020_v19  ;;  %v1910_v41 = vsub.s32 2, %v3020_v19  ;;  %v1906_v44 = vsub.s32 1, %v3020_v19 }
 0x373   : > { %2354 = vmatpush1.bf16.msra.mxu1 %v2900_v52  ;;  %v3033_v45 = vrot.slane %v3027_v42, %v1902_v40  ;;  %v3036_v46 = vrot.slane %v3027_v42, %v1910_v41  ;;  %v3039_v48 = vrot.slane %v3027_v42, %v1906_v44  ;;  %v1918_v40 = vsub.s32 4, %v3020_v19 }
 0x374   : > { %2347 = vmatprep.subr.bf16.mxu1 %v2903_v54  ;;  %v1926_v41 = vsub.s32 6, %v3020_v19 }
 0x376   : > { %1795 = vmatmul.mubr.bf16.gmra.mrb[28].mxu1 %v2882_v36  ;;  %1868 = vmatmul.mubr.bf16.gmra.mrb[36].mxu0 %v2882_v36 }
 0x377   : > { %2355 = vmatpush1.bf16.msra.mxu1 %v2920_v57  ;;  %1804 = vmatprep.mubr.bf16.mxu1 %v2486_v13 }
 0x378   : > { %2348 = vmatprep.subr.bf16.mxu1 %v2923_v59  ;;  %1877 = vmatprep.mubr.bf16.mxu0 %v2486_v13 }
 0x37b   : > { %2356 = vmatpush1.bf16.msra.mxu1 %v2940_v4 }
 0x37c   : > { %2349 = vmatprep.subr.bf16.mxu1 %v2943_v63 }
 0x37e   : > { %1805 = vmatmul.mubr.bf16.gmra.mrb[32].mxu1 %v2890_v43  ;;  %1878 = vmatmul.mubr.bf16.gmra.mrb[40].mxu0 %v2890_v43 }
 0x37f   : > { %2357 = vmatpush1.bf16.msra.mxu1 %v2960_v11  ;;  %1814 = vmatprep.mubr.bf16.mxu1 %v2486_v13 }
 0x380   : > { %2350 = vmatprep.subr.bf16.mxu1 %v2239_v15 }
 0x383   : > { %2358 = vmatpush1.bf16.msra.mxu1 %v2238_v26 }
 0x384   : > { %2351 = vmatprep.subr.bf16.mxu1 %v2247_v30 }
 0x386   : > { %1815 = vmatmul.mubr.bf16.gmra.mrb[36].mxu1 %v2892_v50 }
 0x387   : > { %2359 = vmatpush1.bf16.msra.mxu1 %v2246_v34  ;;  %1887 = vmatprep.mubr.bf16.mxu1 %v2486_v13  ;;  %v1914_v13 = vsub.s32 3, %v3020_v19 }
 0x388   : > { %2352 = vmatprep.subr.bf16.mxu1 %v2255_v37 }
 0x389   : > { %v3042_v25 = vrot.slane %v3027_v42, %v1914_v13 }
 0x38b   : > { %2360 = vmatpush1.bf16.msra.mxu1 %v2254_v39 }
 0x38e   : > { %1888 = vmatmul.mubr.bf16.vlgmr.msra.gmra.mrb[40].mxu1 %v2892_v50 }
 0x421   : > { %v1640_v49 = vpop.f32.mrb[8].mxu1  ;;  %v1713_v23 = vpop.f32.mrb[16].mxu0 }
 0x422   : > { %v1940_v36 = vadd.f32 %v3033_v45, %v1640_v49  ;;  %v1942_v33 = vadd.f32 %v3036_v46, %v1713_v23  ;;  %v1642_v47 = vpop.f32.mrb[9].mxu1  ;;  %v1715_v43 = vpop.f32.mrb[17].mxu0 }
 0x423   : > { %v1941_v50 = vadd.f32 %v3039_v48, %v1642_v47  ;;  %v1943_v51 = vadd.f32 %v3042_v25, %v1715_v43  ;;  %v1644_v52 = vpop.f32.mrb[10].mxu1  ;;  %v1717_v53 = vpop.f32.mrb[18].mxu0 }
 0x424   : > { %2004 = vst [vmem:[%s3048_s16] sm:$0xff] %v1940_v36  ;;  %2006 = vst [vmem:[%s3048_s16 + $0x10] sm:$0xff] %v1942_v33  ;;  %v1948_v54 = vadd.f32 %v3033_v45, %v1644_v52  ;;  %v1950_v55 = vadd.f32 %v3036_v46, %v1717_v53  ;;  %v1646_v9 = vpop.f32.mrb[11].mxu1  ;;  %v1719_v10 = vpop.f32.mrb[19].mxu0  ;;  %v1922_v36 = vsub.s32 5, %v3020_v19  ;;  %v1930_v33 = vsub.s32 7, %v3020_v19 }
 0x425   : > { %2005 = vst [vmem:[%s3048_s16 + $0x8] sm:$0xff] %v1941_v50  ;;  %2007 = vst [vmem:[%s3048_s16 + $0x18] sm:$0xff] %v1943_v51  ;;  %v1949_v14 = vadd.f32 %v3039_v48, %v1646_v9  ;;  %v1951_v56 = vadd.f32 %v3042_v25, %v1719_v10  ;;  %v3116_v19 = vrot.slane %v3027_v42, %v1926_v41 }
 0x426   : > { %2012 = vst [vmem:[%s3048_s16 + $0x40] sm:$0xff] %v1948_v54  ;;  %2014 = vst [vmem:[%s3048_s16 + $0x50] sm:$0xff] %v1950_v55  ;;  %v3113_v54 = vrot.slane %v3027_v42, %v1918_v40 }
 0x427   : > { %2013 = vst [vmem:[%s3048_s16 + $0x48] sm:$0xff] %v1949_v14  ;;  %2015 = vst [vmem:[%s3048_s16 + $0x58] sm:$0xff] %v1951_v56 }
 0x429   : > { %v1650_v57 = vpop.f32.mrb[12].mxu1  ;;  %v1723_v58 = vpop.f32.mrb[20].mxu0 }
 0x42a   : > { %v1956_v59 = vadd.f32 %v3033_v45, %v1650_v57  ;;  %v1958_v60 = vadd.f32 %v3036_v46, %v1723_v58  ;;  %v1652_v61 = vpop.f32.mrb[13].mxu1  ;;  %v1725_v62 = vpop.f32.mrb[21].mxu0 }
 0x42b   : > { %v1957_v0 = vadd.f32 %v3039_v48, %v1652_v61  ;;  %v1959_v1 = vadd.f32 %v3042_v25, %v1725_v62  ;;  %v1654_v4 = vpop.f32.mrb[14].mxu1  ;;  %v1727_v6 = vpop.f32.mrb[22].mxu0 }
 0x42c   : > { %2020 = vst [vmem:[%s3048_s16 + $0x80] sm:$0xff] %v1956_v59  ;;  %2022 = vst [vmem:[%s3048_s16 + $0x90] sm:$0xff] %v1958_v60  ;;  %v1964_v63 = vadd.f32 %v3033_v45, %v1654_v4  ;;  %v1966_v3 = vadd.f32 %v3036_v46, %v1727_v6  ;;  %v1656_v2 = vpop.f32.mrb[15].mxu1  ;;  %v1729_v5 = vpop.f32.mrb[23].mxu0 }
 0x42d   : > { %2021 = vst [vmem:[%s3048_s16 + $0x88] sm:$0xff] %v1957_v0  ;;  %2023 = vst [vmem:[%s3048_s16 + $0x98] sm:$0xff] %v1959_v1  ;;  %v1965_v7 = vadd.f32 %v3039_v48, %v1656_v2  ;;  %v1967_v8 = vadd.f32 %v3042_v25, %v1729_v5 }
 0x42e   : > { %2028 = vst [vmem:[%s3048_s16 + $0xc0] sm:$0xff] %v1964_v63  ;;  %2030 = vst [vmem:[%s3048_s16 + $0xd0] sm:$0xff] %v1966_v3 }
 0x42f   : > { %2029 = vst [vmem:[%s3048_s16 + $0xc8] sm:$0xff] %v1965_v7  ;;  %2031 = vst [vmem:[%s3048_s16 + $0xd8] sm:$0xff] %v1967_v8 }
 0x431   : > { %v1660_v11 = vpop.f32.mrb[16].mxu1  ;;  %v1733_v12 = vpop.f32.mrb[24].mxu0 }
 0x432   : > { %v1972_v15 = vadd.f32 %v3033_v45, %v1660_v11  ;;  %v1974_v16 = vadd.f32 %v3036_v46, %v1733_v12  ;;  %v1662_v17 = vpop.f32.mrb[17].mxu1  ;;  %v1735_v20 = vpop.f32.mrb[25].mxu0 }
 0x433   : > { %v1973_v21 = vadd.f32 %v3039_v48, %v1662_v17  ;;  %v1975_v22 = vadd.f32 %v3042_v25, %v1735_v20  ;;  %v1664_v26 = vpop.f32.mrb[18].mxu1  ;;  %v1737_v27 = vpop.f32.mrb[26].mxu0 }
 0x434   : > { %2036 = vst [vmem:[%s3048_s16 + $0x100] sm:$0xff] %v1972_v15  ;;  %2038 = vst [vmem:[%s3048_s16 + $0x110] sm:$0xff] %v1974_v16  ;;  %v1980_v30 = vadd.f32 %v3033_v45, %v1664_v26  ;;  %v1982_v32 = vadd.f32 %v3036_v46, %v1737_v27  ;;  %v1666_v24 = vpop.f32.mrb[19].mxu1  ;;  %v1739_v28 = vpop.f32.mrb[27].mxu0 }
 0x435   : > { %2037 = vst [vmem:[%s3048_s16 + $0x108] sm:$0xff] %v1973_v21  ;;  %2039 = vst [vmem:[%s3048_s16 + $0x118] sm:$0xff] %v1975_v22  ;;  %v1981_v29 = vadd.f32 %v3039_v48, %v1666_v24  ;;  %v1983_v31 = vadd.f32 %v3042_v25, %v1739_v28 }
 0x436   : > { %2044 = vst [vmem:[%s3048_s16 + $0x140] sm:$0xff] %v1980_v30  ;;  %2046 = vst [vmem:[%s3048_s16 + $0x150] sm:$0xff] %v1982_v32 }
 0x437   : > { %2045 = vst [vmem:[%s3048_s16 + $0x148] sm:$0xff] %v1981_v29  ;;  %2047 = vst [vmem:[%s3048_s16 + $0x158] sm:$0xff] %v1983_v31 }
 0x439   : > { %v1670_v34 = vpop.f32.mrb[20].mxu1  ;;  %v1743_v35 = vpop.f32.mrb[28].mxu0 }
 0x43a   : > { %v1988_v37 = vadd.f32 %v3033_v45, %v1670_v34  ;;  %v1990_v38 = vadd.f32 %v3036_v46, %v1743_v35  ;;  %v1672_v39 = vpop.f32.mrb[21].mxu1  ;;  %v1745_v18 = vpop.f32.mrb[29].mxu0 }
 0x43b   : > { %v1989_v44 = vadd.f32 %v3039_v48, %v1672_v39  ;;  %v1991_v13 = vadd.f32 %v3042_v25, %v1745_v18  ;;  %v1674_v49 = vpop.f32.mrb[22].mxu1  ;;  %v1747_v23 = vpop.f32.mrb[30].mxu0 }
 0x43c   : > { %2052 = vst [vmem:[%s3048_s16 + $0x180] sm:$0xff] %v1988_v37  ;;  %2054 = vst [vmem:[%s3048_s16 + $0x190] sm:$0xff] %v1990_v38  ;;  %v1996_v47 = vadd.f32 %v3033_v45, %v1674_v49  ;;  %v1998_v43 = vadd.f32 %v3036_v46, %v1747_v23  ;;  %v1676_v50 = vpop.f32.mrb[23].mxu1  ;;  %v1749_v51 = vpop.f32.mrb[31].mxu0  ;;  %v3121_v45 = vrot.slane %v3027_v42, %v1922_v36 }
 0x43d   : > { %2053 = vst [vmem:[%s3048_s16 + $0x188] sm:$0xff] %v1989_v44  ;;  %2055 = vst [vmem:[%s3048_s16 + $0x198] sm:$0xff] %v1991_v13  ;;  %v1997_v52 = vadd.f32 %v3039_v48, %v1676_v50  ;;  %v1999_v53 = vadd.f32 %v3042_v25, %v1749_v51  ;;  %v3124_v46 = vrot.slane %v3027_v42, %v1930_v33 }
 0x43e   : > { %2060 = vst [vmem:[%s3048_s16 + $0x1c0] sm:$0xff] %v1996_v47  ;;  %2062 = vst [vmem:[%s3048_s16 + $0x1d0] sm:$0xff] %v1998_v43 }
 0x43f   : > { %2061 = vst [vmem:[%s3048_s16 + $0x1c8] sm:$0xff] %v1997_v52  ;;  %2063 = vst [vmem:[%s3048_s16 + $0x1d8] sm:$0xff] %v1999_v53 }
 0x441   : > { %v1786_v48 = vpop.f32.mrb[24].mxu1  ;;  %v1859_v25 = vpop.f32.mrb[32].mxu0 }
 0x442   : > { %v1944_v55 = vadd.f32 %v3113_v54, %v1786_v48  ;;  %v1946_v9 = vadd.f32 %v3116_v19, %v1859_v25  ;;  %v1788_v10 = vpop.f32.mrb[25].mxu1  ;;  %v1861_v14 = vpop.f32.mrb[33].mxu0 }
 0x443   : > { %v1945_v56 = vadd.f32 %v3121_v45, %v1788_v10  ;;  %v1947_v57 = vadd.f32 %v3124_v46, %v1861_v14  ;;  %v1790_v42 = vpop.f32.mrb[26].mxu1  ;;  %v1863_v58 = vpop.f32.mrb[34].mxu0 }
 0x444   : > { %2008 = vst [vmem:[%s3048_s16 + $0x20] sm:$0xff] %v1944_v55  ;;  %2010 = vst [vmem:[%s3048_s16 + $0x30] sm:$0xff] %v1946_v9  ;;  %v1952_v59 = vadd.f32 %v3113_v54, %v1790_v42  ;;  %v1954_v60 = vadd.f32 %v3116_v19, %v1863_v58  ;;  %v1792_v61 = vpop.f32.mrb[27].mxu1  ;;  %v1865_v62 = vpop.f32.mrb[35].mxu0 }
 0x445   : > { %2009 = vst [vmem:[%s3048_s16 + $0x28] sm:$0xff] %v1945_v56  ;;  %2011 = vst [vmem:[%s3048_s16 + $0x38] sm:$0xff] %v1947_v57  ;;  %v1953_v0 = vadd.f32 %v3121_v45, %v1792_v61  ;;  %v1955_v1 = vadd.f32 %v3124_v46, %v1865_v62 }
 0x446   : > { %2016 = vst [vmem:[%s3048_s16 + $0x60] sm:$0xff] %v1952_v59  ;;  %2018 = vst [vmem:[%s3048_s16 + $0x70] sm:$0xff] %v1954_v60 }
 0x447   : > { %2017 = vst [vmem:[%s3048_s16 + $0x68] sm:$0xff] %v1953_v0  ;;  %2019 = vst [vmem:[%s3048_s16 + $0x78] sm:$0xff] %v1955_v1 }
 0x449   : > { %v1796_v4 = vpop.f32.mrb[28].mxu1  ;;  %v1869_v6 = vpop.f32.mrb[36].mxu0 }
 0x44a   : > { %v1960_v63 = vadd.f32 %v3113_v54, %v1796_v4  ;;  %v1962_v3 = vadd.f32 %v3116_v19, %v1869_v6  ;;  %v1798_v2 = vpop.f32.mrb[29].mxu1  ;;  %v1871_v5 = vpop.f32.mrb[37].mxu0 }
 0x44b   : > { %v1961_v7 = vadd.f32 %v3121_v45, %v1798_v2  ;;  %v1963_v8 = vadd.f32 %v3124_v46, %v1871_v5  ;;  %v1800_v11 = vpop.f32.mrb[30].mxu1  ;;  %v1873_v12 = vpop.f32.mrb[38].mxu0 }
 0x44c   : > { %2024 = vst [vmem:[%s3048_s16 + $0xa0] sm:$0xff] %v1960_v63  ;;  %2026 = vst [vmem:[%s3048_s16 + $0xb0] sm:$0xff] %v1962_v3  ;;  %v1968_v15 = vadd.f32 %v3113_v54, %v1800_v11  ;;  %v1970_v16 = vadd.f32 %v3116_v19, %v1873_v12  ;;  %v1802_v17 = vpop.f32.mrb[31].mxu1  ;;  %v1875_v20 = vpop.f32.mrb[39].mxu0 }
 0x44d   : > { %2025 = vst [vmem:[%s3048_s16 + $0xa8] sm:$0xff] %v1961_v7  ;;  %2027 = vst [vmem:[%s3048_s16 + $0xb8] sm:$0xff] %v1963_v8  ;;  %v1969_v21 = vadd.f32 %v3121_v45, %v1802_v17  ;;  %v1971_v22 = vadd.f32 %v3124_v46, %v1875_v20 }
 0x44e   : > { %2032 = vst [vmem:[%s3048_s16 + $0xe0] sm:$0xff] %v1968_v15  ;;  %2034 = vst [vmem:[%s3048_s16 + $0xf0] sm:$0xff] %v1970_v16 }
 0x44f   : > { %2033 = vst [vmem:[%s3048_s16 + $0xe8] sm:$0xff] %v1969_v21  ;;  %2035 = vst [vmem:[%s3048_s16 + $0xf8] sm:$0xff] %v1971_v22 }
 0x451   : > { %v1806_v26 = vpop.f32.mrb[32].mxu1  ;;  %v1879_v27 = vpop.f32.mrb[40].mxu0 }
 0x452   : > { %v1976_v30 = vadd.f32 %v3113_v54, %v1806_v26  ;;  %v1978_v32 = vadd.f32 %v3116_v19, %v1879_v27  ;;  %v1808_v24 = vpop.f32.mrb[33].mxu1  ;;  %v1881_v28 = vpop.f32.mrb[41].mxu0 }
 0x453   : > { %v1977_v29 = vadd.f32 %v3121_v45, %v1808_v24  ;;  %v1979_v31 = vadd.f32 %v3124_v46, %v1881_v28  ;;  %v1810_v34 = vpop.f32.mrb[34].mxu1  ;;  %v1883_v35 = vpop.f32.mrb[42].mxu0 }
 0x454   : > { %2040 = vst [vmem:[%s3048_s16 + $0x120] sm:$0xff] %v1976_v30  ;;  %2042 = vst [vmem:[%s3048_s16 + $0x130] sm:$0xff] %v1978_v32  ;;  %v1984_v37 = vadd.f32 %v3113_v54, %v1810_v34  ;;  %v1986_v38 = vadd.f32 %v3116_v19, %v1883_v35  ;;  %v1812_v39 = vpop.f32.mrb[35].mxu1  ;;  %v1885_v18 = vpop.f32.mrb[43].mxu0 }
 0x455   : > { %2041 = vst [vmem:[%s3048_s16 + $0x128] sm:$0xff] %v1977_v29  ;;  %2043 = vst [vmem:[%s3048_s16 + $0x138] sm:$0xff] %v1979_v31  ;;  %v1985_v40 = vadd.f32 %v3121_v45, %v1812_v39  ;;  %v1987_v41 = vadd.f32 %v3124_v46, %v1885_v18 }
 0x456   : > { %2048 = vst [vmem:[%s3048_s16 + $0x160] sm:$0xff] %v1984_v37  ;;  %2050 = vst [vmem:[%s3048_s16 + $0x170] sm:$0xff] %v1986_v38 }
 0x457   : > { %2049 = vst [vmem:[%s3048_s16 + $0x168] sm:$0xff] %v1985_v40  ;;  %2051 = vst [vmem:[%s3048_s16 + $0x178] sm:$0xff] %v1987_v41 }
 0x459   : > { %v1816_v44 = vpop.f32.mrb[36].mxu1 }
 0x45a   : > { %v1992_v13 = vadd.f32 %v3113_v54, %v1816_v44  ;;  %v1818_v49 = vpop.f32.mrb[37].mxu1 }
 0x45b   : > { %v1993_v23 = vadd.f32 %v3121_v45, %v1818_v49  ;;  %v1820_v36 = vpop.f32.mrb[38].mxu1 }
 0x45c   : > { %2056 = vst [vmem:[%s3048_s16 + $0x1a0] sm:$0xff] %v1992_v13  ;;  %v2000_v33 = vadd.f32 %v3113_v54, %v1820_v36  ;;  %v1822_v47 = vpop.f32.mrb[39].mxu1 }
 0x45d   : > { %2057 = vst [vmem:[%s3048_s16 + $0x1a8] sm:$0xff] %v1993_v23  ;;  %v2001_v43 = vadd.f32 %v3121_v45, %v1822_v47 }
 0x45e   : > { %2064 = vst [vmem:[%s3048_s16 + $0x1e0] sm:$0xff] %v2000_v33 }
 0x45f   : > { %2065 = vst [vmem:[%s3048_s16 + $0x1e8] sm:$0xff] %v2001_v43 }
 0x461   : > { %v1889_v50 = vpop.f32.mrb[40].mxu1 }
 0x462   : > { %v1994_v51 = vadd.f32 %v3116_v19, %v1889_v50  ;;  %v1891_v52 = vpop.f32.mrb[41].mxu1 }
 0x463   : > { %v1995_v53 = vadd.f32 %v3124_v46, %v1891_v52  ;;  %v1893_v54 = vpop.f32.mrb[42].mxu1 }
 0x464   : > { %2058 = vst [vmem:[%s3048_s16 + $0x1b0] sm:$0xff] %v1994_v51  ;;  %v2002_v45 = vadd.f32 %v3116_v19, %v1893_v54  ;;  %v1895_v48 = vpop.f32.mrb[43].mxu1 }
 0x465   : > { %2059 = vst [vmem:[%s3048_s16 + $0x1b8] sm:$0xff] %v1995_v53  ;;  %v2003_v25 = vadd.f32 %v3124_v46, %v1895_v48 }
 0x466   : > { %2066 = vst [vmem:[%s3048_s16 + $0x1f0] sm:$0xff] %v2002_v45 }
 0x467   : > { %2067 = vst [vmem:[%s3048_s16 + $0x1f8] sm:$0xff] %v2003_v25 }
 0x468   : > { %2435 = shalt.err (!%p2432_p5)
}
 0x469   : > { %s2436_s16 = scalar_lea.hbm %s3190_s23, 8192  ;;  %s2440_s30 = scalar_lea.hbm %s3257_s15, 16384 }
 0x46a   : > { %p2437_p7 = scmp.ne.s32.totalorder %s3190_s23, %s2436_s16  ;;  %p2441_p12 = scmp.lt.u32.totalorder %s3190_s23, %s3257_s15 }
 0x46b   : > { %p2442_p13 = scmp.lt.u32.totalorder %s2440_s30, %s2436_s16  ;;  %p2444_p1 = scmp.lt.u32.totalorder %s2436_s16, %s3190_s23 }
 0x46c   : > { %p2438_p10 = pnand %p2437_p7, %p2609_p6 }
 0x46d   : > { %p2443_p0 = por %p2442_p13, %p2441_p12 }
 0x46e   : > { %p2439_p11 = pneg %p2438_p10 }
 0x46f   : > { %p2445_p2 = por %p2444_p1, %p2443_p0 }
 0x471   : > { %p2446_p3 = pnand %p2445_p2, %p2439_p11 }
 0x473   : > { %2449 = shalt.err (!%p2446_p3)
}
 0x474   : > { %s2488_s1 = smov 1024   ;;  %s2489_s3 = smov 2048  }
 0x475   : > { %s2490_s4 = smov 64   ;;  %s3272_s25 = scalar_lea.sflag [#allocation4], %s2631_s17 }
 0x476   : > { %2361 = dma.vmem_to_hbm [thread:$0]  (%p2609_p6), %s3194_s22, 8192, %s3190_s23, %s3272_s25, %s2488_s1, %s2489_s3, %s2490_s4  }
 0x477 PF: > { %s2097_s0 = sand.u32 1, %s2472_s18   ;;  %p2364_p4 = pnand %p2152_p9, %p2613_p8 }
 0x478   : > { %s2098_s16 = scalar_lea.sflag [#allocation4], %s2097_s0 }
 0x479   : > { %2467 = dma.done.wait (!%p2364_p4), %s2098_s16, 8192  }
 0x47a   : > { %2469 = vsyncadd (!%p2364_p4), %s2098_s16, 4294959104  ;;  %p25_p5 = scmp.ge.s32.totalorder %s2594_s24, 4   ;;  %s3273_s18 = smov %s2476_s19 }
 0x47b   : > { %s3274_s19 = smov %s2480_s20  ;;  %s3275_s20 = smov %s2607_s27 }
 0x47c   : > { %s3276_s21 = smov %s2594_s24  ;;  %27 = sbr.rel (!%p25_p5) target bundleno = 9 (0x9), region = 158 }
 0x483   :  { %2103 = vsyncpa [#allocation4], 1 }
 0x484   :  { %2105 = vsyncpa [#allocation4 + $0x1], 1 }

</bundles_post_ra>
